<compile_context>
chip_gen: v7x
topology: tpu7x:2x2x1
jax: 0.10.0
libtpu: 0.0.40
codegen_flags: <defaults>
</compile_context>

<pallas_src>
import jax
import jax.numpy as jnp
from jax import lax
from jax.experimental import pallas as pl
from jax.experimental.pallas import tpu as pltpu

# ---- static config (small, consistent with the module) ----------------------
B = 2            # batch
C = 4            # inplane == outplane of every component
H = W = 16       # spatial
S = H * W        # 256 -> lane-dense last dim
DEPTH = 2        # ModularNet depth
EMB = 32         # dim_embeddings
K = 4            # number of component modules == number of VQ embeddings
OE = DEPTH * EMB # controller conv output channels


def _fma_linear(xv, w, bias):
    """(B_, Cin) x (Cin, N) + (1, N) -> (B_, N) via VPU broadcast-FMAs (no MXU)."""
    out = jnp.zeros((xv.shape[0], w.shape[1]), jnp.float32) + bias
    for c in range(w.shape[0]):                      # Cin = 4, static unroll
        out = out + xv[:, c:c + 1] * w[c:c + 1, :]
    return out


# ---- single fused kernel: controller + VQ + per-example expert chain --------
def fused_kernel(x_ref, cw_ref, cb_ref, cwr_ref, cbr_ref, emb_ref, ew_ref,
                 eb_ref, ctl_ref, q_ref, idx_ref, y_ref):
    # x_ref: (B, C, S) channels-first; spatial mean is a lane reduction.
    x = x_ref[...]
    xm = jnp.sum(x, axis=-1) * (1.0 / S)             # (B, C) pooled means

    # controller output (1x1 conv commutes with the spatial mean)
    ctl_ref[...] = _fma_linear(xm, cw_ref[...], cb_ref[...])   # (B, OE)

    emb = emb_ref[...]                                # (K, EMB) codebook rows
    y = x                                             # running activation (B, C, S)
    for d in range(DEPTH):                            # static unroll
        # controller columns for this depth slot: (B, EMB)
        c_d = _fma_linear(xm, cwr_ref[d], cbr_ref[d])
        # squared distances to the K codebook rows (E last => lane reduction)
        diff = c_d[:, None, :] - emb[None, :, :]      # (B, K, EMB)
        dist = jnp.sum(diff * diff, axis=-1)          # (B, K)
        iota_k = lax.broadcasted_iota(jnp.int32, dist.shape, 1)
        dmin = jnp.min(dist, axis=1, keepdims=True)
        idx_d = jnp.min(jnp.where(dist <= dmin, iota_k, K), axis=1,
                        keepdims=True).astype(jnp.int32)   # first-occurrence argmin
        idx_ref[:, d:d + 1] = idx_d                   # final (B, DEPTH) layout
        onehot = (iota_k == idx_d).astype(jnp.float32)     # (B, K)

        # quantized vectors (ctl_nearest slot d): codebook-row select on the VPU
        q_d = jnp.zeros((B, EMB), jnp.float32)
        for k in range(K):
            q_d = q_d + onehot[:, k:k + 1] * emb[k:k + 1, :]
        q_ref[d] = q_d                                # (B, EMB)

        # per-example expert weight/bias selection via one-hot VPU FMAs
        w_sel = jnp.zeros((B, C, C), jnp.float32)
        b_sel = jnp.zeros((B, C, 1), jnp.float32)
        for k in range(K):
            oh_k = onehot[:, k:k + 1][:, :, None]     # (B, 1, 1)
            w_sel = w_sel + oh_k * ew_ref[k][None]    # (B, C, C)
            b_sel = b_sel + oh_k * eb_ref[k][None]    # (B, C, 1)

        # apply the selected 1x1-conv expert: 4 broadcast FMAs on (B, C, S)
        y_new = jnp.zeros((B, C, S), jnp.float32) + b_sel
        for ci in range(C):
            y_new = y_new + w_sel[:, :, ci:ci + 1] * y[:, ci:ci + 1, :]
        y = y_new

    y_ref[...] = y                                    # lane-dense (B, C, S) store


# ---- wrapper ----------------------------------------------------------------
def modular_net_forward(x_nchw, params):
    x_flat = x_nchw.reshape(B, C, S)                  # flattened NCHW (free view)

    vmem = pl.BlockSpec(memory_space=pltpu.MemorySpace.VMEM)
    ctl_flat, q_dbe, out_idx, y_flat = pl.pallas_call(
        fused_kernel,
        out_shape=(
            jax.ShapeDtypeStruct((B, OE), jnp.float32),
            jax.ShapeDtypeStruct((DEPTH, B, EMB), jnp.float32),
            jax.ShapeDtypeStruct((B, DEPTH), jnp.int32),
            jax.ShapeDtypeStruct((B, C, S), jnp.float32),
        ),
        in_specs=[vmem] * 8,
        out_specs=(vmem, vmem, vmem, vmem),
    )(x_flat, params["cw_t"], params["cb"], params["cwr"], params["cbr"],
      params["emb_ke"], params["exp_w"], params["exp_b"])

    ctl = ctl_flat.reshape(B, EMB, DEPTH)             # == torch .view(B, E, depth)
    # tiny (2,32,2) transpose; off any kernel->kernel critical path now that
    # everything is fused into one launch.
    ctl_nearest = jnp.transpose(q_dbe, (1, 2, 0))     # (B, EMB, DEPTH)
    y = y_flat.reshape(B, C, H, W)                    # back to NCHW (free view)
    return y, ctl, ctl_nearest, out_idx


# ---- pure-JAX reference (same math, for a correctness check) ----------------
def reference_forward(x_nchw, ctrl_w, ctrl_b, emb_w, exp_w, exp_b):
    x_flat = x_nchw.reshape(B, C, S)
    xm = x_flat.mean(axis=-1)                         # (B, C)
    ctl_flat = xm @ ctrl_w.T + ctrl_b                 # (B, OE)
    ctl = ctl_flat.reshape(B, EMB, DEPTH)
    e_rows = emb_w.T                                  # (K, EMB)
    c_rows = jnp.transpose(ctl, (0, 2, 1)).reshape(B * DEPTH, EMB)
    dist = jnp.sum((c_rows[:, None, :] - e_rows[None, :, :]) ** 2, axis=-1)
    idx = jnp.argmin(dist, axis=1).astype(jnp.int32)
    out_idx = idx.reshape(B, DEPTH)
    ctl_nearest = jnp.transpose(e_rows[idx].reshape(B, DEPTH, EMB), (0, 2, 1))
    ys = []
    for b in range(B):
        yb = x_flat[b]
        for d in range(DEPTH):
            kk = int(out_idx[b, d])
            yb = exp_w[kk] @ yb + exp_b[kk][:, None]
        ys.append(yb)
    y = jnp.stack(ys, axis=0).reshape(B, C, H, W)
    return y, ctl, ctl_nearest, out_idx


if __name__ == "__main__":
    key = jax.random.PRNGKey(0)
    k_x, k_cw, k_cb, k_emb, k_ew, k_eb = jax.random.split(key, 6)

    x = jax.random.normal(k_x, (B, C, H, W), jnp.float32)

    # PyTorch-shaped synthetic parameters
    # TODO(synk): component modules are modeled as Conv2d(C, C, 1) experts
    # (the module accepts arbitrary components with matching in/outplane).
    ctrl_w = jax.random.normal(k_cw, (OE, C), jnp.float32) * 0.1    # Conv2d(C, OE, 1).weight
    ctrl_b = jax.random.normal(k_cb, (OE,), jnp.float32) * 0.1
    emb_w = jax.random.normal(k_emb, (EMB, K), jnp.float32)         # NearestEmbed.weight (E, K)
    exp_w = jax.random.normal(k_ew, (K, C, C), jnp.float32) * 0.5   # K experts: Conv2d(C, C, 1)
    exp_b = jax.random.normal(k_eb, (K, C), jnp.float32) * 0.1

    # host-side parameter layout prep (done once, outside the kernel)
    cw_t = ctrl_w.T                                                 # (C, OE)
    params = {
        "cw_t": cw_t,
        "cb": ctrl_b.reshape(1, OE),
        # columns of the controller weight regrouped per depth slot:
        # cwr[d, c, e] = cw_t[c, e*DEPTH + d]
        "cwr": jnp.transpose(cw_t.reshape(C, EMB, DEPTH), (2, 0, 1)),      # (DEPTH, C, EMB)
        "cbr": jnp.transpose(ctrl_b.reshape(EMB, DEPTH), (1, 0)).reshape(DEPTH, 1, EMB),
        "emb_ke": emb_w.T,                                          # (K, EMB) codebook rows
        "exp_w": exp_w,                                             # (K, C_out, C_in)
        "exp_b": exp_b.reshape(K, C, 1),
    }

    fwd = jax.jit(lambda xx: modular_net_forward(xx, params))
    y, ctl, ctl_nearest, out_idx = jax.block_until_ready(fwd(x))

    # sanity check against pure-JAX reference
    y_r, ctl_r, ctl_n_r, idx_r = reference_forward(x, ctrl_w, ctrl_b, emb_w, exp_w, exp_b)
    assert jnp.array_equal(out_idx, idx_r)
    assert jnp.allclose(ctl, ctl_r, atol=1e-4, rtol=1e-4)
    assert jnp.allclose(ctl_nearest, ctl_n_r, atol=1e-4, rtol=1e-4)
    assert jnp.allclose(y, y_r, atol=1e-4, rtol=1e-4)

    # TODO(synk): weight_sg / .detach() only affect gradients; forward values are exact.
    print("KERNEL_OK")
</pallas_src>

<mosaic_0001>
module attributes {stable_mosaic.version = 11 : i64} {
  func.func @fused_kernel(%arg0: memref<2x4x256xf32, #tpu.memory_space<vmem>>, %arg1: memref<4x64xf32, #tpu.memory_space<vmem>>, %arg2: memref<1x64xf32, #tpu.memory_space<vmem>>, %arg3: memref<2x4x32xf32, #tpu.memory_space<vmem>>, %arg4: memref<2x1x32xf32, #tpu.memory_space<vmem>>, %arg5: memref<4x32xf32, #tpu.memory_space<vmem>>, %arg6: memref<4x4x4xf32, #tpu.memory_space<vmem>>, %arg7: memref<4x4x1xf32, #tpu.memory_space<vmem>>, %arg8: memref<2x64xf32, #tpu.memory_space<vmem>>, %arg9: memref<2x2x32xf32, #tpu.memory_space<vmem>>, %arg10: memref<2x2xi32, #tpu.memory_space<vmem>>, %arg11: memref<2x4x256xf32, #tpu.memory_space<vmem>>) attributes {dimension_semantics = [], scalar_prefetch = 0 : i64, scratch_operands = 0 : i64, tpu.core_type = #tpu.core_type<tc>} {
    %c0 = arith.constant 0 : index
    %c0_0 = arith.constant 0 : index
    %c0_1 = arith.constant 0 : index
    %0 = vector.load %arg0[%c0, %c0_0, %c0_1] : memref<2x4x256xf32, #tpu.memory_space<vmem>>, vector<2x4x256xf32>
    %cst = arith.constant dense<0.000000e+00> : vector<2x4xf32>
    %1 = vector.multi_reduction <add>, %0, %cst [2] : vector<2x4x256xf32> to vector<2x4xf32>
    %cst_2 = arith.constant 3.906250e-03 : f32
    %2 = vector.broadcast %cst_2 : f32 to vector<2x4xf32>
    %3 = arith.mulf %1, %2 : vector<2x4xf32>
    %c0_3 = arith.constant 0 : index
    %c0_4 = arith.constant 0 : index
    %4 = vector.load %arg1[%c0_3, %c0_4] : memref<4x64xf32, #tpu.memory_space<vmem>>, vector<4x64xf32>
    %c0_5 = arith.constant 0 : index
    %c0_6 = arith.constant 0 : index
    %5 = vector.load %arg2[%c0_5, %c0_6] : memref<1x64xf32, #tpu.memory_space<vmem>>, vector<1x64xf32>
    %cst_7 = arith.constant 0.000000e+00 : f32
    %6 = vector.broadcast %cst_7 : f32 to vector<2x64xf32>
    %7 = vector.broadcast %5 : vector<1x64xf32> to vector<2x64xf32>
    %8 = arith.addf %6, %7 : vector<2x64xf32>
    %9 = vector.extract_strided_slice %3 {offsets = [0, 0], sizes = [2, 1], strides = [1, 1]} : vector<2x4xf32> to vector<2x1xf32>
    %10 = vector.extract_strided_slice %4 {offsets = [0, 0], sizes = [1, 64], strides = [1, 1]} : vector<4x64xf32> to vector<1x64xf32>
    %11 = vector.broadcast %9 : vector<2x1xf32> to vector<2x64xf32>
    %12 = vector.broadcast %10 : vector<1x64xf32> to vector<2x64xf32>
    %13 = arith.mulf %11, %12 : vector<2x64xf32>
    %14 = arith.addf %8, %13 : vector<2x64xf32>
    %15 = vector.extract_strided_slice %3 {offsets = [0, 1], sizes = [2, 1], strides = [1, 1]} : vector<2x4xf32> to vector<2x1xf32>
    %16 = vector.extract_strided_slice %4 {offsets = [1, 0], sizes = [1, 64], strides = [1, 1]} : vector<4x64xf32> to vector<1x64xf32>
    %17 = vector.broadcast %15 : vector<2x1xf32> to vector<2x64xf32>
    %18 = vector.broadcast %16 : vector<1x64xf32> to vector<2x64xf32>
    %19 = arith.mulf %17, %18 : vector<2x64xf32>
    %20 = arith.addf %14, %19 : vector<2x64xf32>
    %21 = vector.extract_strided_slice %3 {offsets = [0, 2], sizes = [2, 1], strides = [1, 1]} : vector<2x4xf32> to vector<2x1xf32>
    %22 = vector.extract_strided_slice %4 {offsets = [2, 0], sizes = [1, 64], strides = [1, 1]} : vector<4x64xf32> to vector<1x64xf32>
    %23 = vector.broadcast %21 : vector<2x1xf32> to vector<2x64xf32>
    %24 = vector.broadcast %22 : vector<1x64xf32> to vector<2x64xf32>
    %25 = arith.mulf %23, %24 : vector<2x64xf32>
    %26 = arith.addf %20, %25 : vector<2x64xf32>
    %27 = vector.extract_strided_slice %3 {offsets = [0, 3], sizes = [2, 1], strides = [1, 1]} : vector<2x4xf32> to vector<2x1xf32>
    %28 = vector.extract_strided_slice %4 {offsets = [3, 0], sizes = [1, 64], strides = [1, 1]} : vector<4x64xf32> to vector<1x64xf32>
    %29 = vector.broadcast %27 : vector<2x1xf32> to vector<2x64xf32>
    %30 = vector.broadcast %28 : vector<1x64xf32> to vector<2x64xf32>
    %31 = arith.mulf %29, %30 : vector<2x64xf32>
    %32 = arith.addf %26, %31 : vector<2x64xf32>
    %c0_8 = arith.constant 0 : index
    %c0_9 = arith.constant 0 : index
    %33 = vector.load %arg8[%c0_8, %c0_9] : memref<2x64xf32, #tpu.memory_space<vmem>>, vector<2x64xf32>
    tpu.vector_store %arg8[%c0_8, %c0_9], %32 {strides = array<i32>} : memref<2x64xf32, #tpu.memory_space<vmem>>, vector<2x64xf32>,
    %c0_10 = arith.constant 0 : index
    %c0_11 = arith.constant 0 : index
    %34 = vector.load %arg5[%c0_10, %c0_11] : memref<4x32xf32, #tpu.memory_space<vmem>>, vector<4x32xf32>
    %c0_12 = arith.constant 0 : index
    %c0_13 = arith.constant 0 : index
    %c0_14 = arith.constant 0 : index
    %35 = vector.load %arg3[%c0_12, %c0_13, %c0_14] : memref<2x4x32xf32, #tpu.memory_space<vmem>>, vector<1x4x32xf32>
    %36 = vector.shape_cast %35 : vector<1x4x32xf32> to vector<4x32xf32>
    %c0_15 = arith.constant 0 : index
    %c0_16 = arith.constant 0 : index
    %c0_17 = arith.constant 0 : index
    %37 = vector.load %arg4[%c0_15, %c0_16, %c0_17] : memref<2x1x32xf32, #tpu.memory_space<vmem>>, vector<1x1x32xf32>
    %38 = vector.shape_cast %37 : vector<1x1x32xf32> to vector<1x32xf32>
    %cst_18 = arith.constant 0.000000e+00 : f32
    %39 = vector.broadcast %cst_18 : f32 to vector<2x32xf32>
    %40 = vector.broadcast %38 : vector<1x32xf32> to vector<2x32xf32>
    %41 = arith.addf %39, %40 : vector<2x32xf32>
    %42 = vector.extract_strided_slice %3 {offsets = [0, 0], sizes = [2, 1], strides = [1, 1]} : vector<2x4xf32> to vector<2x1xf32>
    %43 = vector.extract_strided_slice %36 {offsets = [0, 0], sizes = [1, 32], strides = [1, 1]} : vector<4x32xf32> to vector<1x32xf32>
    %44 = vector.broadcast %42 : vector<2x1xf32> to vector<2x32xf32>
    %45 = vector.broadcast %43 : vector<1x32xf32> to vector<2x32xf32>
    %46 = arith.mulf %44, %45 : vector<2x32xf32>
    %47 = arith.addf %41, %46 : vector<2x32xf32>
    %48 = vector.extract_strided_slice %3 {offsets = [0, 1], sizes = [2, 1], strides = [1, 1]} : vector<2x4xf32> to vector<2x1xf32>
    %49 = vector.extract_strided_slice %36 {offsets = [1, 0], sizes = [1, 32], strides = [1, 1]} : vector<4x32xf32> to vector<1x32xf32>
    %50 = vector.broadcast %48 : vector<2x1xf32> to vector<2x32xf32>
    %51 = vector.broadcast %49 : vector<1x32xf32> to vector<2x32xf32>
    %52 = arith.mulf %50, %51 : vector<2x32xf32>
    %53 = arith.addf %47, %52 : vector<2x32xf32>
    %54 = vector.extract_strided_slice %3 {offsets = [0, 2], sizes = [2, 1], strides = [1, 1]} : vector<2x4xf32> to vector<2x1xf32>
    %55 = vector.extract_strided_slice %36 {offsets = [2, 0], sizes = [1, 32], strides = [1, 1]} : vector<4x32xf32> to vector<1x32xf32>
    %56 = vector.broadcast %54 : vector<2x1xf32> to vector<2x32xf32>
    %57 = vector.broadcast %55 : vector<1x32xf32> to vector<2x32xf32>
    %58 = arith.mulf %56, %57 : vector<2x32xf32>
    %59 = arith.addf %53, %58 : vector<2x32xf32>
    %60 = vector.extract_strided_slice %3 {offsets = [0, 3], sizes = [2, 1], strides = [1, 1]} : vector<2x4xf32> to vector<2x1xf32>
    %61 = vector.extract_strided_slice %36 {offsets = [3, 0], sizes = [1, 32], strides = [1, 1]} : vector<4x32xf32> to vector<1x32xf32>
    %62 = vector.broadcast %60 : vector<2x1xf32> to vector<2x32xf32>
    %63 = vector.broadcast %61 : vector<1x32xf32> to vector<2x32xf32>
    %64 = arith.mulf %62, %63 : vector<2x32xf32>
    %65 = arith.addf %59, %64 : vector<2x32xf32>
    %66 = vector.shape_cast %65 : vector<2x32xf32> to vector<2x1x32xf32>
    %67 = vector.shape_cast %34 : vector<4x32xf32> to vector<1x4x32xf32>
    %68 = vector.broadcast %66 : vector<2x1x32xf32> to vector<2x4x32xf32>
    %69 = vector.broadcast %67 : vector<1x4x32xf32> to vector<2x4x32xf32>
    %70 = arith.subf %68, %69 : vector<2x4x32xf32>
    %71 = arith.mulf %70, %70 : vector<2x4x32xf32>
    %cst_19 = arith.constant dense<0.000000e+00> : vector<2x4xf32>
    %72 = vector.multi_reduction <add>, %71, %cst_19 [2] : vector<2x4x32xf32> to vector<2x4xf32>
    %73 = tpu.iota {dimensions = array<i32: 1>} : vector<2x4xi32>
    %cst_20 = arith.constant dense<0x7F800000> : vector<2xf32>
    %74 = vector.multi_reduction <minimumf>, %72, %cst_20 [1] : vector<2x4xf32> to vector<2xf32>
    %75 = vector.shape_cast %74 : vector<2xf32> to vector<2x1xf32>
    %76 = vector.broadcast %75 : vector<2x1xf32> to vector<2x4xf32>
    %77 = arith.cmpf ole, %72, %76 : vector<2x4xf32>
    %c4_i32 = arith.constant 4 : i32
    %78 = vector.broadcast %c4_i32 : i32 to vector<2x4xi32>
    %79 = arith.select %77, %73, %78 : vector<2x4xi1>, vector<2x4xi32>
    %cst_21 = arith.constant dense<2147483647> : vector<2xi32>
    %80 = vector.multi_reduction <minsi>, %79, %cst_21 [1] : vector<2x4xi32> to vector<2xi32>
    %81 = vector.shape_cast %80 : vector<2xi32> to vector<2x1xi32>
    %c0_22 = arith.constant 0 : index
    %c0_23 = arith.constant 0 : index
    %82 = vector.load %arg10[%c0_22, %c0_23] : memref<2x2xi32, #tpu.memory_space<vmem>>, vector<2x1xi32>
    tpu.vector_store %arg10[%c0_22, %c0_23], %81 {strides = array<i32>} : memref<2x2xi32, #tpu.memory_space<vmem>>, vector<2x1xi32>,
    %83 = vector.broadcast %81 : vector<2x1xi32> to vector<2x4xi32>
    %84 = arith.cmpi eq, %73, %83 : vector<2x4xi32>
    %85 = arith.extui %84 : vector<2x4xi1> to vector<2x4xi32>
    %86 = arith.sitofp %85 : vector<2x4xi32> to vector<2x4xf32>
    %cst_24 = arith.constant 0.000000e+00 : f32
    %87 = vector.broadcast %cst_24 : f32 to vector<2x32xf32>
    %88 = vector.extract_strided_slice %86 {offsets = [0, 0], sizes = [2, 1], strides = [1, 1]} : vector<2x4xf32> to vector<2x1xf32>
    %89 = vector.extract_strided_slice %34 {offsets = [0, 0], sizes = [1, 32], strides = [1, 1]} : vector<4x32xf32> to vector<1x32xf32>
    %90 = vector.broadcast %88 : vector<2x1xf32> to vector<2x32xf32>
    %91 = vector.broadcast %89 : vector<1x32xf32> to vector<2x32xf32>
    %92 = arith.mulf %90, %91 : vector<2x32xf32>
    %93 = arith.addf %87, %92 : vector<2x32xf32>
    %94 = vector.extract_strided_slice %86 {offsets = [0, 1], sizes = [2, 1], strides = [1, 1]} : vector<2x4xf32> to vector<2x1xf32>
    %95 = vector.extract_strided_slice %34 {offsets = [1, 0], sizes = [1, 32], strides = [1, 1]} : vector<4x32xf32> to vector<1x32xf32>
    %96 = vector.broadcast %94 : vector<2x1xf32> to vector<2x32xf32>
    %97 = vector.broadcast %95 : vector<1x32xf32> to vector<2x32xf32>
    %98 = arith.mulf %96, %97 : vector<2x32xf32>
    %99 = arith.addf %93, %98 : vector<2x32xf32>
    %100 = vector.extract_strided_slice %86 {offsets = [0, 2], sizes = [2, 1], strides = [1, 1]} : vector<2x4xf32> to vector<2x1xf32>
    %101 = vector.extract_strided_slice %34 {offsets = [2, 0], sizes = [1, 32], strides = [1, 1]} : vector<4x32xf32> to vector<1x32xf32>
    %102 = vector.broadcast %100 : vector<2x1xf32> to vector<2x32xf32>
    %103 = vector.broadcast %101 : vector<1x32xf32> to vector<2x32xf32>
    %104 = arith.mulf %102, %103 : vector<2x32xf32>
    %105 = arith.addf %99, %104 : vector<2x32xf32>
    %106 = vector.extract_strided_slice %86 {offsets = [0, 3], sizes = [2, 1], strides = [1, 1]} : vector<2x4xf32> to vector<2x1xf32>
    %107 = vector.extract_strided_slice %34 {offsets = [3, 0], sizes = [1, 32], strides = [1, 1]} : vector<4x32xf32> to vector<1x32xf32>
    %108 = vector.broadcast %106 : vector<2x1xf32> to vector<2x32xf32>
    %109 = vector.broadcast %107 : vector<1x32xf32> to vector<2x32xf32>
    %110 = arith.mulf %108, %109 : vector<2x32xf32>
    %111 = arith.addf %105, %110 : vector<2x32xf32>
    %c0_25 = arith.constant 0 : index
    %c0_26 = arith.constant 0 : index
    %c0_27 = arith.constant 0 : index
    %112 = vector.load %arg9[%c0_25, %c0_26, %c0_27] : memref<2x2x32xf32, #tpu.memory_space<vmem>>, vector<1x2x32xf32>
    %113 = vector.shape_cast %112 : vector<1x2x32xf32> to vector<2x32xf32>
    %114 = vector.shape_cast %111 : vector<2x32xf32> to vector<1x2x32xf32>
    tpu.vector_store %arg9[%c0_25, %c0_26, %c0_27], %114 {strides = array<i32>} : memref<2x2x32xf32, #tpu.memory_space<vmem>>, vector<1x2x32xf32>,
    %cst_28 = arith.constant 0.000000e+00 : f32
    %115 = vector.broadcast %cst_28 : f32 to vector<2x4x4xf32>
    %cst_29 = arith.constant 0.000000e+00 : f32
    %116 = vector.broadcast %cst_29 : f32 to vector<2x4x1xf32>
    %117 = vector.extract_strided_slice %86 {offsets = [0, 0], sizes = [2, 1], strides = [1, 1]} : vector<2x4xf32> to vector<2x1xf32>
    %118 = vector.shape_cast %117 : vector<2x1xf32> to vector<2x1x1xf32>
    %c0_30 = arith.constant 0 : index
    %c0_31 = arith.constant 0 : index
    %c0_32 = arith.constant 0 : index
    %119 = vector.load %arg6[%c0_30, %c0_31, %c0_32] : memref<4x4x4xf32, #tpu.memory_space<vmem>>, vector<1x4x4xf32>
    %120 = vector.shape_cast %119 : vector<1x4x4xf32> to vector<4x4xf32>
    %121 = vector.shape_cast %120 : vector<4x4xf32> to vector<1x4x4xf32>
    %122 = vector.broadcast %118 : vector<2x1x1xf32> to vector<2x4x4xf32>
    %123 = vector.broadcast %121 : vector<1x4x4xf32> to vector<2x4x4xf32>
    %124 = arith.mulf %122, %123 : vector<2x4x4xf32>
    %125 = arith.addf %115, %124 : vector<2x4x4xf32>
    %c0_33 = arith.constant 0 : index
    %c0_34 = arith.constant 0 : index
    %c0_35 = arith.constant 0 : index
    %126 = vector.load %arg7[%c0_33, %c0_34, %c0_35] : memref<4x4x1xf32, #tpu.memory_space<vmem>>, vector<1x4x1xf32>
    %127 = vector.shape_cast %126 : vector<1x4x1xf32> to vector<4x1xf32>
    %128 = vector.shape_cast %127 : vector<4x1xf32> to vector<1x4x1xf32>
    %129 = vector.broadcast %118 : vector<2x1x1xf32> to vector<2x4x1xf32>
    %130 = vector.broadcast %128 : vector<1x4x1xf32> to vector<2x4x1xf32>
    %131 = arith.mulf %129, %130 : vector<2x4x1xf32>
    %132 = arith.addf %116, %131 : vector<2x4x1xf32>
    %133 = vector.extract_strided_slice %86 {offsets = [0, 1], sizes = [2, 1], strides = [1, 1]} : vector<2x4xf32> to vector<2x1xf32>
    %134 = vector.shape_cast %133 : vector<2x1xf32> to vector<2x1x1xf32>
    %c1 = arith.constant 1 : index
    %c0_36 = arith.constant 0 : index
    %c0_37 = arith.constant 0 : index
    %135 = vector.load %arg6[%c1, %c0_36, %c0_37] : memref<4x4x4xf32, #tpu.memory_space<vmem>>, vector<1x4x4xf32>
    %136 = vector.shape_cast %135 : vector<1x4x4xf32> to vector<4x4xf32>
    %137 = vector.shape_cast %136 : vector<4x4xf32> to vector<1x4x4xf32>
    %138 = vector.broadcast %134 : vector<2x1x1xf32> to vector<2x4x4xf32>
    %139 = vector.broadcast %137 : vector<1x4x4xf32> to vector<2x4x4xf32>
    %140 = arith.mulf %138, %139 : vector<2x4x4xf32>
    %141 = arith.addf %125, %140 : vector<2x4x4xf32>
    %c1_38 = arith.constant 1 : index
    %c0_39 = arith.constant 0 : index
    %c0_40 = arith.constant 0 : index
    %142 = vector.load %arg7[%c1_38, %c0_39, %c0_40] : memref<4x4x1xf32, #tpu.memory_space<vmem>>, vector<1x4x1xf32>
    %143 = vector.shape_cast %142 : vector<1x4x1xf32> to vector<4x1xf32>
    %144 = vector.shape_cast %143 : vector<4x1xf32> to vector<1x4x1xf32>
    %145 = vector.broadcast %134 : vector<2x1x1xf32> to vector<2x4x1xf32>
    %146 = vector.broadcast %144 : vector<1x4x1xf32> to vector<2x4x1xf32>
    %147 = arith.mulf %145, %146 : vector<2x4x1xf32>
    %148 = arith.addf %132, %147 : vector<2x4x1xf32>
    %149 = vector.extract_strided_slice %86 {offsets = [0, 2], sizes = [2, 1], strides = [1, 1]} : vector<2x4xf32> to vector<2x1xf32>
    %150 = vector.shape_cast %149 : vector<2x1xf32> to vector<2x1x1xf32>
    %c2 = arith.constant 2 : index
    %c0_41 = arith.constant 0 : index
    %c0_42 = arith.constant 0 : index
    %151 = vector.load %arg6[%c2, %c0_41, %c0_42] : memref<4x4x4xf32, #tpu.memory_space<vmem>>, vector<1x4x4xf32>
    %152 = vector.shape_cast %151 : vector<1x4x4xf32> to vector<4x4xf32>
    %153 = vector.shape_cast %152 : vector<4x4xf32> to vector<1x4x4xf32>
    %154 = vector.broadcast %150 : vector<2x1x1xf32> to vector<2x4x4xf32>
    %155 = vector.broadcast %153 : vector<1x4x4xf32> to vector<2x4x4xf32>
    %156 = arith.mulf %154, %155 : vector<2x4x4xf32>
    %157 = arith.addf %141, %156 : vector<2x4x4xf32>
    %c2_43 = arith.constant 2 : index
    %c0_44 = arith.constant 0 : index
    %c0_45 = arith.constant 0 : index
    %158 = vector.load %arg7[%c2_43, %c0_44, %c0_45] : memref<4x4x1xf32, #tpu.memory_space<vmem>>, vector<1x4x1xf32>
    %159 = vector.shape_cast %158 : vector<1x4x1xf32> to vector<4x1xf32>
    %160 = vector.shape_cast %159 : vector<4x1xf32> to vector<1x4x1xf32>
    %161 = vector.broadcast %150 : vector<2x1x1xf32> to vector<2x4x1xf32>
    %162 = vector.broadcast %160 : vector<1x4x1xf32> to vector<2x4x1xf32>
    %163 = arith.mulf %161, %162 : vector<2x4x1xf32>
    %164 = arith.addf %148, %163 : vector<2x4x1xf32>
    %165 = vector.extract_strided_slice %86 {offsets = [0, 3], sizes = [2, 1], strides = [1, 1]} : vector<2x4xf32> to vector<2x1xf32>
    %166 = vector.shape_cast %165 : vector<2x1xf32> to vector<2x1x1xf32>
    %c3 = arith.constant 3 : index
    %c0_46 = arith.constant 0 : index
    %c0_47 = arith.constant 0 : index
    %167 = vector.load %arg6[%c3, %c0_46, %c0_47] : memref<4x4x4xf32, #tpu.memory_space<vmem>>, vector<1x4x4xf32>
    %168 = vector.shape_cast %167 : vector<1x4x4xf32> to vector<4x4xf32>
    %169 = vector.shape_cast %168 : vector<4x4xf32> to vector<1x4x4xf32>
    %170 = vector.broadcast %166 : vector<2x1x1xf32> to vector<2x4x4xf32>
    %171 = vector.broadcast %169 : vector<1x4x4xf32> to vector<2x4x4xf32>
    %172 = arith.mulf %170, %171 : vector<2x4x4xf32>
    %173 = arith.addf %157, %172 : vector<2x4x4xf32>
    %c3_48 = arith.constant 3 : index
    %c0_49 = arith.constant 0 : index
    %c0_50 = arith.constant 0 : index
    %174 = vector.load %arg7[%c3_48, %c0_49, %c0_50] : memref<4x4x1xf32, #tpu.memory_space<vmem>>, vector<1x4x1xf32>
    %175 = vector.shape_cast %174 : vector<1x4x1xf32> to vector<4x1xf32>
    %176 = vector.shape_cast %175 : vector<4x1xf32> to vector<1x4x1xf32>
    %177 = vector.broadcast %166 : vector<2x1x1xf32> to vector<2x4x1xf32>
    %178 = vector.broadcast %176 : vector<1x4x1xf32> to vector<2x4x1xf32>
    %179 = arith.mulf %177, %178 : vector<2x4x1xf32>
    %180 = arith.addf %164, %179 : vector<2x4x1xf32>
    %cst_51 = arith.constant 0.000000e+00 : f32
    %181 = vector.broadcast %cst_51 : f32 to vector<2x4x256xf32>
    %182 = vector.broadcast %180 : vector<2x4x1xf32> to vector<2x4x256xf32>
    %183 = arith.addf %181, %182 : vector<2x4x256xf32>
    %184 = vector.extract_strided_slice %173 {offsets = [0, 0, 0], sizes = [2, 4, 1], strides = [1, 1, 1]} : vector<2x4x4xf32> to vector<2x4x1xf32>
    %185 = vector.extract_strided_slice %0 {offsets = [0, 0, 0], sizes = [2, 1, 256], strides = [1, 1, 1]} : vector<2x4x256xf32> to vector<2x1x256xf32>
    %186 = vector.broadcast %184 : vector<2x4x1xf32> to vector<2x4x256xf32>
    %187 = vector.broadcast %185 : vector<2x1x256xf32> to vector<2x4x256xf32>
    %188 = arith.mulf %186, %187 : vector<2x4x256xf32>
    %189 = arith.addf %183, %188 : vector<2x4x256xf32>
    %190 = vector.extract_strided_slice %173 {offsets = [0, 0, 1], sizes = [2, 4, 1], strides = [1, 1, 1]} : vector<2x4x4xf32> to vector<2x4x1xf32>
    %191 = vector.extract_strided_slice %0 {offsets = [0, 1, 0], sizes = [2, 1, 256], strides = [1, 1, 1]} : vector<2x4x256xf32> to vector<2x1x256xf32>
    %192 = vector.broadcast %190 : vector<2x4x1xf32> to vector<2x4x256xf32>
    %193 = vector.broadcast %191 : vector<2x1x256xf32> to vector<2x4x256xf32>
    %194 = arith.mulf %192, %193 : vector<2x4x256xf32>
    %195 = arith.addf %189, %194 : vector<2x4x256xf32>
    %196 = vector.extract_strided_slice %173 {offsets = [0, 0, 2], sizes = [2, 4, 1], strides = [1, 1, 1]} : vector<2x4x4xf32> to vector<2x4x1xf32>
    %197 = vector.extract_strided_slice %0 {offsets = [0, 2, 0], sizes = [2, 1, 256], strides = [1, 1, 1]} : vector<2x4x256xf32> to vector<2x1x256xf32>
    %198 = vector.broadcast %196 : vector<2x4x1xf32> to vector<2x4x256xf32>
    %199 = vector.broadcast %197 : vector<2x1x256xf32> to vector<2x4x256xf32>
    %200 = arith.mulf %198, %199 : vector<2x4x256xf32>
    %201 = arith.addf %195, %200 : vector<2x4x256xf32>
    %202 = vector.extract_strided_slice %173 {offsets = [0, 0, 3], sizes = [2, 4, 1], strides = [1, 1, 1]} : vector<2x4x4xf32> to vector<2x4x1xf32>
    %203 = vector.extract_strided_slice %0 {offsets = [0, 3, 0], sizes = [2, 1, 256], strides = [1, 1, 1]} : vector<2x4x256xf32> to vector<2x1x256xf32>
    %204 = vector.broadcast %202 : vector<2x4x1xf32> to vector<2x4x256xf32>
    %205 = vector.broadcast %203 : vector<2x1x256xf32> to vector<2x4x256xf32>
    %206 = arith.mulf %204, %205 : vector<2x4x256xf32>
    %207 = arith.addf %201, %206 : vector<2x4x256xf32>
    %c1_52 = arith.constant 1 : index
    %c0_53 = arith.constant 0 : index
    %c0_54 = arith.constant 0 : index
    %208 = vector.load %arg3[%c1_52, %c0_53, %c0_54] : memref<2x4x32xf32, #tpu.memory_space<vmem>>, vector<1x4x32xf32>
    %209 = vector.shape_cast %208 : vector<1x4x32xf32> to vector<4x32xf32>
    %c1_55 = arith.constant 1 : index
    %c0_56 = arith.constant 0 : index
    %c0_57 = arith.constant 0 : index
    %210 = vector.load %arg4[%c1_55, %c0_56, %c0_57] : memref<2x1x32xf32, #tpu.memory_space<vmem>>, vector<1x1x32xf32>
    %211 = vector.shape_cast %210 : vector<1x1x32xf32> to vector<1x32xf32>
    %cst_58 = arith.constant 0.000000e+00 : f32
    %212 = vector.broadcast %cst_58 : f32 to vector<2x32xf32>
    %213 = vector.broadcast %211 : vector<1x32xf32> to vector<2x32xf32>
    %214 = arith.addf %212, %213 : vector<2x32xf32>
    %215 = vector.extract_strided_slice %3 {offsets = [0, 0], sizes = [2, 1], strides = [1, 1]} : vector<2x4xf32> to vector<2x1xf32>
    %216 = vector.extract_strided_slice %209 {offsets = [0, 0], sizes = [1, 32], strides = [1, 1]} : vector<4x32xf32> to vector<1x32xf32>
    %217 = vector.broadcast %215 : vector<2x1xf32> to vector<2x32xf32>
    %218 = vector.broadcast %216 : vector<1x32xf32> to vector<2x32xf32>
    %219 = arith.mulf %217, %218 : vector<2x32xf32>
    %220 = arith.addf %214, %219 : vector<2x32xf32>
    %221 = vector.extract_strided_slice %3 {offsets = [0, 1], sizes = [2, 1], strides = [1, 1]} : vector<2x4xf32> to vector<2x1xf32>
    %222 = vector.extract_strided_slice %209 {offsets = [1, 0], sizes = [1, 32], strides = [1, 1]} : vector<4x32xf32> to vector<1x32xf32>
    %223 = vector.broadcast %221 : vector<2x1xf32> to vector<2x32xf32>
    %224 = vector.broadcast %222 : vector<1x32xf32> to vector<2x32xf32>
    %225 = arith.mulf %223, %224 : vector<2x32xf32>
    %226 = arith.addf %220, %225 : vector<2x32xf32>
    %227 = vector.extract_strided_slice %3 {offsets = [0, 2], sizes = [2, 1], strides = [1, 1]} : vector<2x4xf32> to vector<2x1xf32>
    %228 = vector.extract_strided_slice %209 {offsets = [2, 0], sizes = [1, 32], strides = [1, 1]} : vector<4x32xf32> to vector<1x32xf32>
    %229 = vector.broadcast %227 : vector<2x1xf32> to vector<2x32xf32>
    %230 = vector.broadcast %228 : vector<1x32xf32> to vector<2x32xf32>
    %231 = arith.mulf %229, %230 : vector<2x32xf32>
    %232 = arith.addf %226, %231 : vector<2x32xf32>
    %233 = vector.extract_strided_slice %3 {offsets = [0, 3], sizes = [2, 1], strides = [1, 1]} : vector<2x4xf32> to vector<2x1xf32>
    %234 = vector.extract_strided_slice %209 {offsets = [3, 0], sizes = [1, 32], strides = [1, 1]} : vector<4x32xf32> to vector<1x32xf32>
    %235 = vector.broadcast %233 : vector<2x1xf32> to vector<2x32xf32>
    %236 = vector.broadcast %234 : vector<1x32xf32> to vector<2x32xf32>
    %237 = arith.mulf %235, %236 : vector<2x32xf32>
    %238 = arith.addf %232, %237 : vector<2x32xf32>
    %239 = vector.shape_cast %238 : vector<2x32xf32> to vector<2x1x32xf32>
    %240 = vector.shape_cast %34 : vector<4x32xf32> to vector<1x4x32xf32>
    %241 = vector.broadcast %239 : vector<2x1x32xf32> to vector<2x4x32xf32>
    %242 = vector.broadcast %240 : vector<1x4x32xf32> to vector<2x4x32xf32>
    %243 = arith.subf %241, %242 : vector<2x4x32xf32>
    %244 = arith.mulf %243, %243 : vector<2x4x32xf32>
    %cst_59 = arith.constant dense<0.000000e+00> : vector<2x4xf32>
    %245 = vector.multi_reduction <add>, %244, %cst_59 [2] : vector<2x4x32xf32> to vector<2x4xf32>
    %246 = tpu.iota {dimensions = array<i32: 1>} : vector<2x4xi32>
    %cst_60 = arith.constant dense<0x7F800000> : vector<2xf32>
    %247 = vector.multi_reduction <minimumf>, %245, %cst_60 [1] : vector<2x4xf32> to vector<2xf32>
    %248 = vector.shape_cast %247 : vector<2xf32> to vector<2x1xf32>
    %249 = vector.broadcast %248 : vector<2x1xf32> to vector<2x4xf32>
    %250 = arith.cmpf ole, %245, %249 : vector<2x4xf32>
    %c4_i32_61 = arith.constant 4 : i32
    %251 = vector.broadcast %c4_i32_61 : i32 to vector<2x4xi32>
    %252 = arith.select %250, %246, %251 : vector<2x4xi1>, vector<2x4xi32>
    %cst_62 = arith.constant dense<2147483647> : vector<2xi32>
    %253 = vector.multi_reduction <minsi>, %252, %cst_62 [1] : vector<2x4xi32> to vector<2xi32>
    %254 = vector.shape_cast %253 : vector<2xi32> to vector<2x1xi32>
    %c0_63 = arith.constant 0 : index
    %c1_64 = arith.constant 1 : index
    %255 = vector.load %arg10[%c0_63, %c1_64] : memref<2x2xi32, #tpu.memory_space<vmem>>, vector<2x1xi32>
    tpu.vector_store %arg10[%c0_63, %c1_64], %254 {strides = array<i32>} : memref<2x2xi32, #tpu.memory_space<vmem>>, vector<2x1xi32>,
    %256 = vector.broadcast %254 : vector<2x1xi32> to vector<2x4xi32>
    %257 = arith.cmpi eq, %246, %256 : vector<2x4xi32>
    %258 = arith.extui %257 : vector<2x4xi1> to vector<2x4xi32>
    %259 = arith.sitofp %258 : vector<2x4xi32> to vector<2x4xf32>
    %cst_65 = arith.constant 0.000000e+00 : f32
    %260 = vector.broadcast %cst_65 : f32 to vector<2x32xf32>
    %261 = vector.extract_strided_slice %259 {offsets = [0, 0], sizes = [2, 1], strides = [1, 1]} : vector<2x4xf32> to vector<2x1xf32>
    %262 = vector.extract_strided_slice %34 {offsets = [0, 0], sizes = [1, 32], strides = [1, 1]} : vector<4x32xf32> to vector<1x32xf32>
    %263 = vector.broadcast %261 : vector<2x1xf32> to vector<2x32xf32>
    %264 = vector.broadcast %262 : vector<1x32xf32> to vector<2x32xf32>
    %265 = arith.mulf %263, %264 : vector<2x32xf32>
    %266 = arith.addf %260, %265 : vector<2x32xf32>
    %267 = vector.extract_strided_slice %259 {offsets = [0, 1], sizes = [2, 1], strides = [1, 1]} : vector<2x4xf32> to vector<2x1xf32>
    %268 = vector.extract_strided_slice %34 {offsets = [1, 0], sizes = [1, 32], strides = [1, 1]} : vector<4x32xf32> to vector<1x32xf32>
    %269 = vector.broadcast %267 : vector<2x1xf32> to vector<2x32xf32>
    %270 = vector.broadcast %268 : vector<1x32xf32> to vector<2x32xf32>
    %271 = arith.mulf %269, %270 : vector<2x32xf32>
    %272 = arith.addf %266, %271 : vector<2x32xf32>
    %273 = vector.extract_strided_slice %259 {offsets = [0, 2], sizes = [2, 1], strides = [1, 1]} : vector<2x4xf32> to vector<2x1xf32>
    %274 = vector.extract_strided_slice %34 {offsets = [2, 0], sizes = [1, 32], strides = [1, 1]} : vector<4x32xf32> to vector<1x32xf32>
    %275 = vector.broadcast %273 : vector<2x1xf32> to vector<2x32xf32>
    %276 = vector.broadcast %274 : vector<1x32xf32> to vector<2x32xf32>
    %277 = arith.mulf %275, %276 : vector<2x32xf32>
    %278 = arith.addf %272, %277 : vector<2x32xf32>
    %279 = vector.extract_strided_slice %259 {offsets = [0, 3], sizes = [2, 1], strides = [1, 1]} : vector<2x4xf32> to vector<2x1xf32>
    %280 = vector.extract_strided_slice %34 {offsets = [3, 0], sizes = [1, 32], strides = [1, 1]} : vector<4x32xf32> to vector<1x32xf32>
    %281 = vector.broadcast %279 : vector<2x1xf32> to vector<2x32xf32>
    %282 = vector.broadcast %280 : vector<1x32xf32> to vector<2x32xf32>
    %283 = arith.mulf %281, %282 : vector<2x32xf32>
    %284 = arith.addf %278, %283 : vector<2x32xf32>
    %c1_66 = arith.constant 1 : index
    %c0_67 = arith.constant 0 : index
    %c0_68 = arith.constant 0 : index
    %285 = vector.load %arg9[%c1_66, %c0_67, %c0_68] : memref<2x2x32xf32, #tpu.memory_space<vmem>>, vector<1x2x32xf32>
    %286 = vector.shape_cast %285 : vector<1x2x32xf32> to vector<2x32xf32>
    %287 = vector.shape_cast %284 : vector<2x32xf32> to vector<1x2x32xf32>
    tpu.vector_store %arg9[%c1_66, %c0_67, %c0_68], %287 {strides = array<i32>} : memref<2x2x32xf32, #tpu.memory_space<vmem>>, vector<1x2x32xf32>,
    %cst_69 = arith.constant 0.000000e+00 : f32
    %288 = vector.broadcast %cst_69 : f32 to vector<2x4x4xf32>
    %cst_70 = arith.constant 0.000000e+00 : f32
    %289 = vector.broadcast %cst_70 : f32 to vector<2x4x1xf32>
    %290 = vector.extract_strided_slice %259 {offsets = [0, 0], sizes = [2, 1], strides = [1, 1]} : vector<2x4xf32> to vector<2x1xf32>
    %291 = vector.shape_cast %290 : vector<2x1xf32> to vector<2x1x1xf32>
    %c0_71 = arith.constant 0 : index
    %c0_72 = arith.constant 0 : index
    %c0_73 = arith.constant 0 : index
    %292 = vector.load %arg6[%c0_71, %c0_72, %c0_73] : memref<4x4x4xf32, #tpu.memory_space<vmem>>, vector<1x4x4xf32>
    %293 = vector.shape_cast %292 : vector<1x4x4xf32> to vector<4x4xf32>
    %294 = vector.shape_cast %293 : vector<4x4xf32> to vector<1x4x4xf32>
    %295 = vector.broadcast %291 : vector<2x1x1xf32> to vector<2x4x4xf32>
    %296 = vector.broadcast %294 : vector<1x4x4xf32> to vector<2x4x4xf32>
    %297 = arith.mulf %295, %296 : vector<2x4x4xf32>
    %298 = arith.addf %288, %297 : vector<2x4x4xf32>
    %c0_74 = arith.constant 0 : index
    %c0_75 = arith.constant 0 : index
    %c0_76 = arith.constant 0 : index
    %299 = vector.load %arg7[%c0_74, %c0_75, %c0_76] : memref<4x4x1xf32, #tpu.memory_space<vmem>>, vector<1x4x1xf32>
    %300 = vector.shape_cast %299 : vector<1x4x1xf32> to vector<4x1xf32>
    %301 = vector.shape_cast %300 : vector<4x1xf32> to vector<1x4x1xf32>
    %302 = vector.broadcast %291 : vector<2x1x1xf32> to vector<2x4x1xf32>
    %303 = vector.broadcast %301 : vector<1x4x1xf32> to vector<2x4x1xf32>
    %304 = arith.mulf %302, %303 : vector<2x4x1xf32>
    %305 = arith.addf %289, %304 : vector<2x4x1xf32>
    %306 = vector.extract_strided_slice %259 {offsets = [0, 1], sizes = [2, 1], strides = [1, 1]} : vector<2x4xf32> to vector<2x1xf32>
    %307 = vector.shape_cast %306 : vector<2x1xf32> to vector<2x1x1xf32>
    %c1_77 = arith.constant 1 : index
    %c0_78 = arith.constant 0 : index
    %c0_79 = arith.constant 0 : index
    %308 = vector.load %arg6[%c1_77, %c0_78, %c0_79] : memref<4x4x4xf32, #tpu.memory_space<vmem>>, vector<1x4x4xf32>
    %309 = vector.shape_cast %308 : vector<1x4x4xf32> to vector<4x4xf32>
    %310 = vector.shape_cast %309 : vector<4x4xf32> to vector<1x4x4xf32>
    %311 = vector.broadcast %307 : vector<2x1x1xf32> to vector<2x4x4xf32>
    %312 = vector.broadcast %310 : vector<1x4x4xf32> to vector<2x4x4xf32>
    %313 = arith.mulf %311, %312 : vector<2x4x4xf32>
    %314 = arith.addf %298, %313 : vector<2x4x4xf32>
    %c1_80 = arith.constant 1 : index
    %c0_81 = arith.constant 0 : index
    %c0_82 = arith.constant 0 : index
    %315 = vector.load %arg7[%c1_80, %c0_81, %c0_82] : memref<4x4x1xf32, #tpu.memory_space<vmem>>, vector<1x4x1xf32>
    %316 = vector.shape_cast %315 : vector<1x4x1xf32> to vector<4x1xf32>
    %317 = vector.shape_cast %316 : vector<4x1xf32> to vector<1x4x1xf32>
    %318 = vector.broadcast %307 : vector<2x1x1xf32> to vector<2x4x1xf32>
    %319 = vector.broadcast %317 : vector<1x4x1xf32> to vector<2x4x1xf32>
    %320 = arith.mulf %318, %319 : vector<2x4x1xf32>
    %321 = arith.addf %305, %320 : vector<2x4x1xf32>
    %322 = vector.extract_strided_slice %259 {offsets = [0, 2], sizes = [2, 1], strides = [1, 1]} : vector<2x4xf32> to vector<2x1xf32>
    %323 = vector.shape_cast %322 : vector<2x1xf32> to vector<2x1x1xf32>
    %c2_83 = arith.constant 2 : index
    %c0_84 = arith.constant 0 : index
    %c0_85 = arith.constant 0 : index
    %324 = vector.load %arg6[%c2_83, %c0_84, %c0_85] : memref<4x4x4xf32, #tpu.memory_space<vmem>>, vector<1x4x4xf32>
    %325 = vector.shape_cast %324 : vector<1x4x4xf32> to vector<4x4xf32>
    %326 = vector.shape_cast %325 : vector<4x4xf32> to vector<1x4x4xf32>
    %327 = vector.broadcast %323 : vector<2x1x1xf32> to vector<2x4x4xf32>
    %328 = vector.broadcast %326 : vector<1x4x4xf32> to vector<2x4x4xf32>
    %329 = arith.mulf %327, %328 : vector<2x4x4xf32>
    %330 = arith.addf %314, %329 : vector<2x4x4xf32>
    %c2_86 = arith.constant 2 : index
    %c0_87 = arith.constant 0 : index
    %c0_88 = arith.constant 0 : index
    %331 = vector.load %arg7[%c2_86, %c0_87, %c0_88] : memref<4x4x1xf32, #tpu.memory_space<vmem>>, vector<1x4x1xf32>
    %332 = vector.shape_cast %331 : vector<1x4x1xf32> to vector<4x1xf32>
    %333 = vector.shape_cast %332 : vector<4x1xf32> to vector<1x4x1xf32>
    %334 = vector.broadcast %323 : vector<2x1x1xf32> to vector<2x4x1xf32>
    %335 = vector.broadcast %333 : vector<1x4x1xf32> to vector<2x4x1xf32>
    %336 = arith.mulf %334, %335 : vector<2x4x1xf32>
    %337 = arith.addf %321, %336 : vector<2x4x1xf32>
    %338 = vector.extract_strided_slice %259 {offsets = [0, 3], sizes = [2, 1], strides = [1, 1]} : vector<2x4xf32> to vector<2x1xf32>
    %339 = vector.shape_cast %338 : vector<2x1xf32> to vector<2x1x1xf32>
    %c3_89 = arith.constant 3 : index
    %c0_90 = arith.constant 0 : index
    %c0_91 = arith.constant 0 : index
    %340 = vector.load %arg6[%c3_89, %c0_90, %c0_91] : memref<4x4x4xf32, #tpu.memory_space<vmem>>, vector<1x4x4xf32>
    %341 = vector.shape_cast %340 : vector<1x4x4xf32> to vector<4x4xf32>
    %342 = vector.shape_cast %341 : vector<4x4xf32> to vector<1x4x4xf32>
    %343 = vector.broadcast %339 : vector<2x1x1xf32> to vector<2x4x4xf32>
    %344 = vector.broadcast %342 : vector<1x4x4xf32> to vector<2x4x4xf32>
    %345 = arith.mulf %343, %344 : vector<2x4x4xf32>
    %346 = arith.addf %330, %345 : vector<2x4x4xf32>
    %c3_92 = arith.constant 3 : index
    %c0_93 = arith.constant 0 : index
    %c0_94 = arith.constant 0 : index
    %347 = vector.load %arg7[%c3_92, %c0_93, %c0_94] : memref<4x4x1xf32, #tpu.memory_space<vmem>>, vector<1x4x1xf32>
    %348 = vector.shape_cast %347 : vector<1x4x1xf32> to vector<4x1xf32>
    %349 = vector.shape_cast %348 : vector<4x1xf32> to vector<1x4x1xf32>
    %350 = vector.broadcast %339 : vector<2x1x1xf32> to vector<2x4x1xf32>
    %351 = vector.broadcast %349 : vector<1x4x1xf32> to vector<2x4x1xf32>
    %352 = arith.mulf %350, %351 : vector<2x4x1xf32>
    %353 = arith.addf %337, %352 : vector<2x4x1xf32>
    %cst_95 = arith.constant 0.000000e+00 : f32
    %354 = vector.broadcast %cst_95 : f32 to vector<2x4x256xf32>
    %355 = vector.broadcast %353 : vector<2x4x1xf32> to vector<2x4x256xf32>
    %356 = arith.addf %354, %355 : vector<2x4x256xf32>
    %357 = vector.extract_strided_slice %346 {offsets = [0, 0, 0], sizes = [2, 4, 1], strides = [1, 1, 1]} : vector<2x4x4xf32> to vector<2x4x1xf32>
    %358 = vector.extract_strided_slice %207 {offsets = [0, 0, 0], sizes = [2, 1, 256], strides = [1, 1, 1]} : vector<2x4x256xf32> to vector<2x1x256xf32>
    %359 = vector.broadcast %357 : vector<2x4x1xf32> to vector<2x4x256xf32>
    %360 = vector.broadcast %358 : vector<2x1x256xf32> to vector<2x4x256xf32>
    %361 = arith.mulf %359, %360 : vector<2x4x256xf32>
    %362 = arith.addf %356, %361 : vector<2x4x256xf32>
    %363 = vector.extract_strided_slice %346 {offsets = [0, 0, 1], sizes = [2, 4, 1], strides = [1, 1, 1]} : vector<2x4x4xf32> to vector<2x4x1xf32>
    %364 = vector.extract_strided_slice %207 {offsets = [0, 1, 0], sizes = [2, 1, 256], strides = [1, 1, 1]} : vector<2x4x256xf32> to vector<2x1x256xf32>
    %365 = vector.broadcast %363 : vector<2x4x1xf32> to vector<2x4x256xf32>
    %366 = vector.broadcast %364 : vector<2x1x256xf32> to vector<2x4x256xf32>
    %367 = arith.mulf %365, %366 : vector<2x4x256xf32>
    %368 = arith.addf %362, %367 : vector<2x4x256xf32>
    %369 = vector.extract_strided_slice %346 {offsets = [0, 0, 2], sizes = [2, 4, 1], strides = [1, 1, 1]} : vector<2x4x4xf32> to vector<2x4x1xf32>
    %370 = vector.extract_strided_slice %207 {offsets = [0, 2, 0], sizes = [2, 1, 256], strides = [1, 1, 1]} : vector<2x4x256xf32> to vector<2x1x256xf32>
    %371 = vector.broadcast %369 : vector<2x4x1xf32> to vector<2x4x256xf32>
    %372 = vector.broadcast %370 : vector<2x1x256xf32> to vector<2x4x256xf32>
    %373 = arith.mulf %371, %372 : vector<2x4x256xf32>
    %374 = arith.addf %368, %373 : vector<2x4x256xf32>
    %375 = vector.extract_strided_slice %346 {offsets = [0, 0, 3], sizes = [2, 4, 1], strides = [1, 1, 1]} : vector<2x4x4xf32> to vector<2x4x1xf32>
    %376 = vector.extract_strided_slice %207 {offsets = [0, 3, 0], sizes = [2, 1, 256], strides = [1, 1, 1]} : vector<2x4x256xf32> to vector<2x1x256xf32>
    %377 = vector.broadcast %375 : vector<2x4x1xf32> to vector<2x4x256xf32>
    %378 = vector.broadcast %376 : vector<2x1x256xf32> to vector<2x4x256xf32>
    %379 = arith.mulf %377, %378 : vector<2x4x256xf32>
    %380 = arith.addf %374, %379 : vector<2x4x256xf32>
    %c0_96 = arith.constant 0 : index
    %c0_97 = arith.constant 0 : index
    %c0_98 = arith.constant 0 : index
    %381 = vector.load %arg11[%c0_96, %c0_97, %c0_98] : memref<2x4x256xf32, #tpu.memory_space<vmem>>, vector<2x4x256xf32>
    tpu.vector_store %arg11[%c0_96, %c0_97, %c0_98], %380 {strides = array<i32>} : memref<2x4x256xf32, #tpu.memory_space<vmem>>, vector<2x4x256xf32>,
    return
  }
}

</mosaic_0001>

<bundles_post_ra>
// kernel: _lambda_.1
= control target key start
LH: loop header
LB: loop body
LE: loop exit
PB: predicated region body
PF: predicated region fallthrough
CT: control target
= control target key end

     0   :  { %vm42_vm0 = vcmask 1043456   ;;  %v4069_v1 = vlaneseq  ;;  %s4055_s0 = inlined_call_operand.vmem [shape: f32[2,4,256], index: 0, kind: input, shape index: {}]   ;;  %s4056_s1 = inlined_call_operand.vmem [shape: f32[4,64], index: 1, kind: input, shape index: {}]   ;;  %s4057_s2 = inlined_call_operand.vmem [shape: f32[1,64], index: 2, kind: input, shape index: {}]   ;;  %s4058_s3 = inlined_call_operand.vmem [shape: f32[2,4,32], index: 3, kind: input, shape index: {}]   ;;  %s4059_s4 = inlined_call_operand.vmem [shape: f32[2,1,32], index: 4, kind: input, shape index: {}]   ;;  %s4060_s5 = inlined_call_operand.vmem [shape: f32[4,32], index: 5, kind: input, shape index: {}]   ;;  %s4061_s6 = inlined_call_operand.vmem [shape: f32[4,4,4], index: 6, kind: input, shape index: {}]   ;;  %s4062_s7 = inlined_call_operand.vmem [shape: f32[4,4,1], index: 7, kind: input, shape index: {}]   ;;  %s4063_s8 = inlined_call_operand.vmem [shape: f32[2,64], index: 8, kind: output, shape index: {0}]   ;;  %s4064_s9 = inlined_call_operand.vmem [shape: f32[2,2,32], index: 9, kind: output, shape index: {1}]   ;;  %s4065_s10 = inlined_call_operand.hbm [shape: s32[2,2], index: 10, kind: output, shape index: {2}]   ;;  %s4066_s11 = inlined_call_operand.vmem [shape: f32[2,4,256], index: 11, kind: output, shape index: {3}]  }
   0x1   :  { %v34_v0 = vld [vmem:[%s4055_s0] sm:$0xff]  ;;  %v35_v2 = vld [vmem:[%s4055_s0 + $0x8] sm:$0xff] }
   0x2   :  { %v38_v3 = vcombine.high %v34_v0, %v34_v0  ;;  %v43_v4 = vsel %vm42_vm0, %v34_v0, 0.0  ;;  %v39_v5 = vcombine.high %v35_v2, %v35_v2 }
   0x3   :  { %17 = vsyncpa [#allocation3], 0  ;;  %v2969_v6 = vshrl.u32 %v4069_v1, 7  ;;  %v2974_v8 = vld [vmem:[%s4056_s1] sm:$0xf]  ;;  %v48_v9 = vsel %vm42_vm0, %v35_v2, 0.0 }
   0x4   :  { %v44_v7 = vsel %vm42_vm0, %v38_v3, 0.0  ;;  %v49_v10 = vsel %vm42_vm0, %v39_v5, 0.0  ;;  %v4067_v15 = vmov 0   ;;  %vm207_vm1 = vcmask 130112   ;;  %s2891_s15 = smov 1   ;;  %s2892_s18 = smov 2  }
   0x5   :  { %v45_v11 = vadd.f32 %v44_v7, %v43_v4  ;;  %v2977_v12 = vsub.s32 0, %v2969_v6  ;;  %v50_v14 = vadd.f32 %v49_v10, %v48_v9  ;;  %2807 = vset.pattern.permute.xlu0 %v4067_v15  ;;  %2806 = vset.pattern.permute.xlu1 %v4067_v15  ;;  %v2984_v16 = vsub.s32 1, %v2969_v6  ;;  %s2893_s21 = smov 3   ;;  %s2899_s26 = smov 127  }
   0x6   :  { %v2989_v18 = vsub.s32 2, %v2969_v6  ;;  %vm214_vm2 = vcmask 195712   ;;  %vm221_vm3 = vcmask 261312   ;;  %vm290_vm4 = vcmask 1041409   ;;  %s2900_s27 = smov 125  }
   0x7   :  { %46 = vadd.xlane.f32.xlu0 %v45_v11  ;;  %v75_v13 = vrot.slane %v2974_v8, %v2977_v12  ;;  %v305_v17 = vrot.slane %v2974_v8, %v2984_v16  ;;  %vm1402_vm5 = vcmask 257024   ;;  %vm1421_vm6 = vcmask 25600  }
   0x8   :  { %4074 = vst [vmem:[#allocation5_spill] sm:$0xff] %v2989_v18  ;;  %v518_v19 = vrot.slane %v2974_v8, %v2989_v18  ;;  %vm228_vm11 = vcmask 326912   ;;  %vm235_vm12 = vcmask 392512   ;;  %vm242_vm13 = vcmask 458112  }
   0x9   :  { %78 = vbcast.lane.b32.xlu1 %v75_v13, 256  ;;  %vm249_vm14 = vcmask 523712   ;;  %vm933_vm0 = vcmask 517120  }
   0xb   :  { %51 = vadd.xlane.f32.xlu0 %v50_v14 }
   0xd   :  { %82 = vbcast.lane.b32.xlu1 %v75_v13, 264 }
  0x11   :  { %90 = vbcast.lane.b32.xlu1 %v75_v13, 280 }
  0x15   :  { %94 = vbcast.lane.b32.xlu1 %v75_v13, 288 }
  0x19   :  { %98 = vbcast.lane.b32.xlu1 %v75_v13, 296 }
  0x1d   :  { %102 = vbcast.lane.b32.xlu1 %v75_v13, 304 }
  0x21   :  { %106 = vbcast.lane.b32.xlu1 %v75_v13, 312  ;;  %86 = vbcast.lane.b32.xlu0 %v75_v13, 272 }
  0x25   :  { %312 = vbcast.lane.b32.xlu1 %v305_v17, 264  ;;  %308 = vbcast.lane.b32.xlu0 %v305_v17, 256 }
  0x29   :  { %320 = vbcast.lane.b32.xlu1 %v305_v17, 280  ;;  %316 = vbcast.lane.b32.xlu0 %v305_v17, 272 }
  0x2d   :  { %328 = vbcast.lane.b32.xlu1 %v305_v17, 296  ;;  %324 = vbcast.lane.b32.xlu0 %v305_v17, 288 }
  0x31   :  { %336 = vbcast.lane.b32.xlu1 %v305_v17, 312  ;;  %332 = vbcast.lane.b32.xlu0 %v305_v17, 304 }
  0x35   :  { %525 = vbcast.lane.b32.xlu1 %v518_v19, 264  ;;  %521 = vbcast.lane.b32.xlu0 %v518_v19, 256 }
  0x39   :  { %533 = vbcast.lane.b32.xlu1 %v518_v19, 280  ;;  %529 = vbcast.lane.b32.xlu0 %v518_v19, 272 }
  0x3d   :  { %541 = vbcast.lane.b32.xlu1 %v518_v19, 296  ;;  %537 = vbcast.lane.b32.xlu0 %v518_v19, 288 }
  0x41   :  { %549 = vbcast.lane.b32.xlu1 %v518_v19, 312  ;;  %545 = vbcast.lane.b32.xlu0 %v518_v19, 304 }
  0x7b   :  { %v79_v20 = vpop.permute.xlu1 %78 }
  0x7f   :  { %v83_v21 = vpop.permute.xlu1 %82 }
  0x83   :  { %v91_v22 = vpop.permute.xlu1 %90 }
  0x87   :  { %v95_v23 = vpop.permute.xlu1 %94 }
  0x8b   :  { %v99_v30 = vpop.permute.xlu1 %98 }
  0x8f   :  { %v103_v35 = vpop.permute.xlu1 %102 }
  0x93   :  { %v107_v41 = vpop.permute.xlu1 %106 }
  0x94   :  { %v47_v24 = vpop.xlane.xlu0 %46 }
  0x95   :  { %v2993_v25 = vmul.f32 0.00390625, %v47_v24 }
  0x97   :  { %v2997_v26 = vrot.slane %v2993_v25, %v2977_v12  ;;  %v3021_v50 = vrot.slane %v2993_v25, %v2984_v16  ;;  %v313_v51 = vpop.permute.xlu1 %312  ;;  %v3045_v19 = vrot.slane %v2993_v25, %v2989_v18 }
  0x98   :  { %v52_v27 = vpop.xlane.xlu0 %51 }
  0x99   :  { %v117_v28 = vmul.f32 %v83_v21, %v2997_v26  ;;  %v116_v29 = vmul.f32 %v79_v20, %v2997_v26  ;;  %v3001_v32 = vmul.f32 0.00390625, %v52_v27  ;;  %v120_v34 = vmul.f32 %v95_v23, %v2997_v26 }
  0x9a   :  { %v122_v37 = vmul.f32 %v103_v35, %v2997_v26  ;;  %v119_v38 = vmul.f32 %v91_v22, %v2997_v26  ;;  %v121_v40 = vmul.f32 %v99_v30, %v2997_v26  ;;  %v123_v43 = vmul.f32 %v107_v41, %v2997_v26 }
  0x9b   :  { %152 = vperm.xlu0 %2807, %v117_v28   ;;  %149 = vperm.xlu1 %2806, %v116_v29   ;;  %v3007_v36 = vrot.slane %v3001_v32, %v2977_v12  ;;  %v321_v57 = vpop.permute.xlu1 %320  ;;  %v347_v59 = vmul.f32 %v313_v51, %v3021_v50  ;;  %v3033_v0 = vrot.slane %v3001_v32, %v2984_v16 }
  0x9c   :  { %v87_v31 = vpop.permute.xlu0 %86  ;;  %v349_v63 = vmul.f32 %v321_v57, %v3021_v50 }
  0x9d   :  { %v118_v33 = vmul.f32 %v87_v31, %v2997_v26  ;;  %v124_v39 = vmul.f32 %v79_v20, %v3007_v36  ;;  %v126_v42 = vmul.f32 %v87_v31, %v3007_v36  ;;  %v128_v45 = vmul.f32 %v95_v23, %v3007_v36 }
  0x9e   :  { %v125_v46 = vmul.f32 %v83_v21, %v3007_v36  ;;  %v130_v47 = vmul.f32 %v103_v35, %v3007_v36  ;;  %v127_v49 = vmul.f32 %v91_v22, %v3007_v36  ;;  %v129_v53 = vmul.f32 %v99_v30, %v3007_v36 }
  0x9f   :  { %161 = vperm.xlu0 %2807, %v120_v34   ;;  %155 = vperm.xlu1 %2806, %v118_v33   ;;  %v131_v56 = vmul.f32 %v107_v41, %v3007_v36  ;;  %v329_v61 = vpop.permute.xlu1 %328  ;;  %v355_v11 = vmul.f32 %v313_v51, %v3033_v0  ;;  %v357_v14 = vmul.f32 %v321_v57, %v3033_v0 }
  0xa0   :  { %v309_v44 = vpop.permute.xlu0 %308  ;;  %v351_v3 = vmul.f32 %v329_v61, %v3021_v50  ;;  %v359_v22 = vmul.f32 %v329_v61, %v3033_v0 }
  0xa1   :  { %v346_v52 = vmul.f32 %v309_v44, %v3021_v50  ;;  %v354_v2 = vmul.f32 %v309_v44, %v3033_v0 }
  0xa3   :  { %167 = vperm.xlu0 %2807, %v122_v37   ;;  %158 = vperm.xlu1 %2806, %v119_v38   ;;  %v337_v4 = vpop.permute.xlu1 %336  ;;  %v3057_v37 = vrot.slane %v3001_v32, %v2989_v18 }
  0xa4   :  { %v317_v48 = vpop.permute.xlu0 %316  ;;  %v353_v7 = vmul.f32 %v337_v4, %v3021_v50  ;;  %v361_v27 = vmul.f32 %v337_v4, %v3033_v0 }
  0xa5   :  { %v348_v55 = vmul.f32 %v317_v48, %v3021_v50  ;;  %v356_v5 = vmul.f32 %v317_v48, %v3033_v0 }
  0xa7   :  { %173 = vperm.xlu0 %2807, %v124_v39   ;;  %164 = vperm.xlu1 %2806, %v121_v40   ;;  %v526_v20 = vpop.permute.xlu1 %525 }
  0xa8   :  { %v325_v54 = vpop.permute.xlu0 %324  ;;  %v560_v30 = vmul.f32 %v526_v20, %v3045_v19  ;;  %v568_v44 = vmul.f32 %v526_v20, %v3057_v37 }
  0xa9   :  { %v350_v58 = vmul.f32 %v325_v54, %v3021_v50  ;;  %v358_v10 = vmul.f32 %v325_v54, %v3033_v0 }
  0xab   :  { %179 = vperm.xlu0 %2807, %v126_v42   ;;  %170 = vperm.xlu1 %2806, %v123_v43   ;;  %v534_v28 = vpop.permute.xlu1 %533 }
  0xac   :  { %v333_v60 = vpop.permute.xlu0 %332  ;;  %v562_v35 = vmul.f32 %v534_v28, %v3045_v19 }
  0xad   :  { %v352_v62 = vmul.f32 %v333_v60, %v3021_v50  ;;  %v360_v13 = vmul.f32 %v333_v60, %v3033_v0 }
  0xaf   :  { %185 = vperm.xlu0 %2807, %v128_v45   ;;  %176 = vperm.xlu1 %2806, %v125_v46   ;;  %v542_v33 = vpop.permute.xlu1 %541  ;;  %v3066_v45 = vsub.s32 3, %v2969_v6 }
  0xb0   :  { %v522_v9 = vpop.permute.xlu0 %521  ;;  %v564_v39 = vmul.f32 %v542_v33, %v3045_v19 }
  0xb1   :  { %v559_v21 = vmul.f32 %v522_v9, %v3045_v19  ;;  %v567_v38 = vmul.f32 %v522_v9, %v3057_v37  ;;  %4075 = vst [vmem:[#allocation6_spill] sm:$0xff] %v3066_v45  ;;  %v731_v48 = vrot.slane %v2974_v8, %v3066_v45 }
  0xb3   :  { %191 = vperm.xlu0 %2807, %v130_v47   ;;  %182 = vperm.xlu1 %2806, %v127_v49   ;;  %v550_v40 = vpop.permute.xlu1 %549  ;;  %v570_v47 = vmul.f32 %v534_v28, %v3057_v37  ;;  %v572_v49 = vmul.f32 %v542_v33, %v3057_v37 }
  0xb4   :  { %v530_v17 = vpop.permute.xlu0 %529  ;;  %v566_v42 = vmul.f32 %v550_v40, %v3045_v19  ;;  %v574_v51 = vmul.f32 %v550_v40, %v3057_v37 }
  0xb5   :  { %v561_v24 = vmul.f32 %v530_v17, %v3045_v19  ;;  %v569_v41 = vmul.f32 %v530_v17, %v3057_v37 }
  0xb7   :  { %379 = vperm.xlu0 %2807, %v346_v52   ;;  %188 = vperm.xlu1 %2806, %v129_v53  }
  0xb8   :  { %v538_v23 = vpop.permute.xlu0 %537 }
  0xb9   :  { %v563_v29 = vmul.f32 %v538_v23, %v3045_v19  ;;  %v571_v43 = vmul.f32 %v538_v23, %v3057_v37 }
  0xbb   :  { %385 = vperm.xlu0 %2807, %v348_v55   ;;  %194 = vperm.xlu1 %2806, %v131_v56  }
  0xbc   :  { %v546_v31 = vpop.permute.xlu0 %545 }
  0xbd   :  { %v565_v34 = vmul.f32 %v546_v31, %v3045_v19  ;;  %v573_v46 = vmul.f32 %v546_v31, %v3057_v37 }
  0xbf   :  { %391 = vperm.xlu0 %2807, %v350_v58   ;;  %382 = vperm.xlu1 %2806, %v347_v59  }
  0xc3   :  { %397 = vperm.xlu0 %2807, %v352_v62   ;;  %388 = vperm.xlu1 %2806, %v349_v63  }
  0xc7   :  { %403 = vperm.xlu0 %2807, %v354_v2   ;;  %394 = vperm.xlu1 %2806, %v351_v3  }
  0xcb   :  { %409 = vperm.xlu0 %2807, %v356_v5   ;;  %400 = vperm.xlu1 %2806, %v353_v7  }
  0xcf   :  { %415 = vperm.xlu0 %2807, %v358_v10   ;;  %406 = vperm.xlu1 %2806, %v355_v11  }
  0xd3   :  { %421 = vperm.xlu0 %2807, %v360_v13   ;;  %412 = vperm.xlu1 %2806, %v357_v14  }
  0xd7   :  { %592 = vperm.xlu0 %2807, %v559_v21   ;;  %418 = vperm.xlu1 %2806, %v359_v22  }
  0xdb   :  { %598 = vperm.xlu0 %2807, %v561_v24   ;;  %424 = vperm.xlu1 %2806, %v361_v27  }
  0xdf   :  { %604 = vperm.xlu0 %2807, %v563_v29   ;;  %595 = vperm.xlu1 %2806, %v560_v30  }
  0xe3   :  { %610 = vperm.xlu0 %2807, %v565_v34   ;;  %601 = vperm.xlu1 %2806, %v562_v35  }
  0xe7   :  { %616 = vperm.xlu0 %2807, %v567_v38   ;;  %607 = vperm.xlu1 %2806, %v564_v39  }
  0xeb   :  { %622 = vperm.xlu0 %2807, %v569_v41   ;;  %613 = vperm.xlu1 %2806, %v566_v42  }
  0xef   :  { %628 = vperm.xlu0 %2807, %v571_v43   ;;  %619 = vperm.xlu1 %2806, %v568_v44  }
  0xf3   :  { %634 = vperm.xlu0 %2807, %v573_v46   ;;  %625 = vperm.xlu1 %2806, %v570_v47  }
  0xf7   :  { %734 = vbcast.lane.b32.xlu0 %v731_v48, 256  ;;  %631 = vperm.xlu1 %2806, %v572_v49  }
  0xfb   :  { %742 = vbcast.lane.b32.xlu0 %v731_v48, 272  ;;  %637 = vperm.xlu1 %2806, %v574_v51  }
  0xff   :  { %750 = vbcast.lane.b32.xlu0 %v731_v48, 288  ;;  %738 = vbcast.lane.b32.xlu1 %v731_v48, 264 }
 0x103   :  { %758 = vbcast.lane.b32.xlu0 %v731_v48, 304  ;;  %746 = vbcast.lane.b32.xlu1 %v731_v48, 280 }
 0x107   :  { %754 = vbcast.lane.b32.xlu1 %v731_v48, 296 }
 0x10b   :  { %762 = vbcast.lane.b32.xlu1 %v731_v48, 312  ;;  %v3168_v48 = vrot.slane %v2993_v25, %v3066_v45 }
 0x11a   :  { %v3074_v52 = vpop.permute.xlu0 %152  ;;  %v3076_v53 = vpop.permute.xlu1 %149 }
 0x11e   :  { %v3078_v8 = vpop.permute.xlu0 %161  ;;  %v3080_v54 = vpop.permute.xlu1 %155 }
 0x122   :  { %v3082_v55 = vpop.permute.xlu0 %167  ;;  %v3084_v56 = vpop.permute.xlu1 %158 }
 0x123   :  { %4076 = vst [vmem:[#allocation7_spill] sm:$0xff] %v3082_v55 }
 0x126   :  { %v3086_v57 = vpop.permute.xlu0 %173  ;;  %v3088_v58 = vpop.permute.xlu1 %164 }
 0x12a   :  { %v3090_v59 = vpop.permute.xlu0 %179  ;;  %v3092_v60 = vpop.permute.xlu1 %170 }
 0x12b   :  { %4077 = vst [vmem:[#allocation8_spill] sm:$0xff] %v3092_v60 }
 0x12e   :  { %v3094_v61 = vpop.permute.xlu0 %185  ;;  %v3096_v62 = vpop.permute.xlu1 %176 }
 0x12f   :  { %4078 = vst [vmem:[#allocation9_spill] sm:$0xff] %v3094_v61 }
 0x132   :  { %v3098_v63 = vpop.permute.xlu0 %191  ;;  %v3100_v2 = vpop.permute.xlu1 %182 }
 0x133   :  { %4079 = vst [vmem:[#allocation10_spill] sm:$0xff] %v3098_v63 }
 0x136   :  { %v3102_v3 = vpop.permute.xlu0 %379  ;;  %v3104_v4 = vpop.permute.xlu1 %188 }
 0x13a   :  { %v3106_v5 = vpop.permute.xlu0 %385  ;;  %v3108_v7 = vpop.permute.xlu1 %194 }
 0x13b   :  { %4080 = vst [vmem:[#allocation11_spill] sm:$0xff] %v3106_v5  ;;  %4081 = vst [vmem:[#allocation12_spill] sm:$0xff] %v3108_v7 }
 0x13e   :  { %v3110_v9 = vpop.permute.xlu0 %391  ;;  %v3112_v10 = vpop.permute.xlu1 %382 }
 0x13f   :  { %4082 = vst [vmem:[#allocation13_spill] sm:$0xff] %v3110_v9 }
 0x142   :  { %v3114_v11 = vpop.permute.xlu0 %397  ;;  %v3116_v13 = vpop.permute.xlu1 %388 }
 0x143   :  { %4083 = vst [vmem:[#allocation14_spill] sm:$0xff] %v3114_v11  ;;  %4084 = vst [vmem:[#allocation15_spill] sm:$0xff] %v3116_v13 }
 0x146   :  { %v3118_v14 = vpop.permute.xlu0 %403  ;;  %v3120_v17 = vpop.permute.xlu1 %394 }
 0x147   :  { %4085 = vst [vmem:[#allocation16_spill] sm:$0xff] %v3118_v14  ;;  %4086 = vst [vmem:[#allocation17_spill] sm:$0xff] %v3120_v17 }
 0x14a   :  { %v3122_v20 = vpop.permute.xlu0 %409  ;;  %v3124_v21 = vpop.permute.xlu1 %400 }
 0x14b   :  { %4087 = vst [vmem:[#allocation18_spill] sm:$0xff] %v3122_v20  ;;  %4088 = vst [vmem:[#allocation19_spill] sm:$0xff] %v3124_v21 }
 0x14e   :  { %v3126_v22 = vpop.permute.xlu0 %415  ;;  %v3128_v23 = vpop.permute.xlu1 %406 }
 0x14f   :  { %4089 = vst [vmem:[#allocation20_spill] sm:$0xff] %v3126_v22 }
 0x152   :  { %v3130_v24 = vpop.permute.xlu0 %421  ;;  %v3132_v27 = vpop.permute.xlu1 %412 }
 0x153   :  { %4090 = vst [vmem:[#allocation21_spill] sm:$0xff] %v3130_v24  ;;  %4091 = vst [vmem:[#allocation22_spill] sm:$0xff] %v3132_v27 }
 0x156   :  { %v3134_v28 = vpop.permute.xlu0 %592  ;;  %v3136_v29 = vpop.permute.xlu1 %418 }
 0x157   :  { %4092 = vst [vmem:[#allocation23_spill] sm:$0xff] %v3134_v28  ;;  %4093 = vst [vmem:[#allocation24_spill] sm:$0xff] %v3136_v29 }
 0x15a   :  { %v3138_v30 = vpop.permute.xlu0 %598  ;;  %v3140_v31 = vpop.permute.xlu1 %424 }
 0x15b   :  { %4094 = vst [vmem:[#allocation25_spill] sm:$0xff] %v3138_v30  ;;  %4095 = vst [vmem:[#allocation26_spill] sm:$0xff] %v3140_v31 }
 0x15e   :  { %v3142_v33 = vpop.permute.xlu0 %604  ;;  %v3144_v34 = vpop.permute.xlu1 %595 }
 0x15f   :  { %4096 = vst [vmem:[#allocation27_spill] sm:$0xff] %v3142_v33  ;;  %4097 = vst [vmem:[#allocation28_spill] sm:$0xff] %v3144_v34 }
 0x162   :  { %v3146_v35 = vpop.permute.xlu0 %610  ;;  %v3148_v38 = vpop.permute.xlu1 %601 }
 0x163   :  { %4098 = vst [vmem:[#allocation29_spill] sm:$0xff] %v3146_v35  ;;  %4099 = vst [vmem:[#allocation30_spill] sm:$0xff] %v3148_v38 }
 0x166   :  { %v3150_v39 = vpop.permute.xlu0 %616  ;;  %v3152_v40 = vpop.permute.xlu1 %607 }
 0x167   :  { %4100 = vst [vmem:[#allocation31_spill] sm:$0xff] %v3150_v39  ;;  %4101 = vst [vmem:[#allocation32_spill] sm:$0xff] %v3152_v40 }
 0x16a   :  { %v3154_v41 = vpop.permute.xlu0 %622  ;;  %v3156_v42 = vpop.permute.xlu1 %613 }
 0x16b   :  { %4102 = vst [vmem:[#allocation33_spill] sm:$0xff] %v3154_v41  ;;  %4103 = vst [vmem:[#allocation34_spill] sm:$0xff] %v3156_v42 }
 0x16e   :  { %v3158_v43 = vpop.permute.xlu0 %628  ;;  %v3160_v44 = vpop.permute.xlu1 %619 }
 0x16f   :  { %4104 = vst [vmem:[#allocation35_spill] sm:$0xff] %v3158_v43  ;;  %4105 = vst [vmem:[#allocation36_spill] sm:$0xff] %v3160_v44 }
 0x172   :  { %v3162_v46 = vpop.permute.xlu0 %634  ;;  %v3164_v47 = vpop.permute.xlu1 %625 }
 0x173   :  { %4106 = vst [vmem:[#allocation37_spill] sm:$0xff] %v3162_v46  ;;  %4107 = vst [vmem:[#allocation38_spill] sm:$0xff] %v3164_v47 }
 0x176   :  { %v735_v49 = vpop.permute.xlu0 %734  ;;  %v3170_v51 = vpop.permute.xlu1 %631 }
 0x177   :  { %4108 = vst [vmem:[#allocation39_spill] sm:$0xff] %v3170_v51  ;;  %v772_v15 = vmul.f32 %v735_v49, %v3168_v48 }
 0x179   :  { %805 = vperm.xlu0 %2807, %v772_v15  }
 0x17a   :  { %v743_v1 = vpop.permute.xlu0 %742  ;;  %v3173_v35 = vpop.permute.xlu1 %637 }
 0x17b   :  { %4109 = vst [vmem:[#allocation40_spill] sm:$0xff] %v3173_v35  ;;  %v774_v42 = vmul.f32 %v743_v1, %v3168_v48  ;;  %v3185_v35 = vrot.slane %v3001_v32, %v3066_v45  ;;  %v936_v32 = vld [vmem:[%s4058_s3] sm:$0xf] }
 0x17d   :  { %811 = vperm.xlu0 %2807, %v774_v42   ;;  %v780_v42 = vmul.f32 %v735_v49, %v3185_v35 }
 0x17e   :  { %v751_v40 = vpop.permute.xlu0 %750  ;;  %v739_v46 = vpop.permute.xlu1 %738 }
 0x17f   :  { %v776_v33 = vmul.f32 %v751_v40, %v3168_v48  ;;  %v773_v43 = vmul.f32 %v739_v46, %v3168_v48  ;;  %v781_v49 = vmul.f32 %v739_v46, %v3185_v35  ;;  %v1263_v46 = vrot.slane %v936_v32, %v3066_v45 }
 0x181   :  { %817 = vperm.xlu0 %2807, %v776_v33   ;;  %808 = vperm.xlu1 %2806, %v773_v43   ;;  %v782_v43 = vmul.f32 %v743_v1, %v3185_v35 }
 0x182   :  { %v3178_v25 = vpop.permute.xlu0 %758  ;;  %v747_v51 = vpop.permute.xlu1 %746 }
 0x183   :  { %v778_v15 = vmul.f32 %v3178_v25, %v3168_v48  ;;  %v775_v30 = vmul.f32 %v747_v51, %v3168_v48  ;;  %v783_v1 = vmul.f32 %v747_v51, %v3185_v35 }
 0x185   :  { %823 = vperm.xlu0 %2807, %v778_v15   ;;  %814 = vperm.xlu1 %2806, %v775_v30   ;;  %v784_v30 = vmul.f32 %v751_v40, %v3185_v35  ;;  %v948_v15 = vrot.slane %v936_v32, %v2977_v12  ;;  %v1158_v40 = vrot.slane %v936_v32, %v2989_v18 }
 0x186   :  { %v755_v31 = vpop.permute.xlu1 %754 }
 0x187   :  { %v777_v33 = vmul.f32 %v755_v31, %v3168_v48 }
 0x189   :  { %829 = vperm.xlu0 %2807, %v780_v42   ;;  %820 = vperm.xlu1 %2806, %v777_v33   ;;  %v785_v42 = vmul.f32 %v755_v31, %v3185_v35  ;;  %v2782_v31 = vld [vmem:[%s4058_s3 + $0x4] sm:$0xf]  ;;  %s2898_s3 = smov 126  }
 0x18a   :  { %v3190_v21 = vpop.permute.xlu1 %762  ;;  %v1903_v51 = vrot.slane %v2782_v31, %v2977_v12  ;;  %v2008_v33 = vrot.slane %v2782_v31, %v2984_v16 }
 0x18b   :  { %v779_v41 = vmul.f32 %v3190_v21, %v3168_v48 }
 0x18d   :  { %835 = vperm.xlu0 %2807, %v782_v43   ;;  %826 = vperm.xlu1 %2806, %v779_v41   ;;  %v1053_v41 = vrot.slane %v936_v32, %v2984_v16  ;;  %v2113_v43 = vrot.slane %v2782_v31, %v2989_v18  ;;  %v2218_v32 = vrot.slane %v2782_v31, %v3066_v45 }
 0x191   :  { %841 = vperm.xlu0 %2807, %v784_v30   ;;  %832 = vperm.xlu1 %2806, %v781_v49  }
 0x195   :  { %951 = vbcast.lane.b32.xlu0 %v948_v15, 256  ;;  %838 = vperm.xlu1 %2806, %v783_v1  }
 0x199   :  { %959 = vbcast.lane.b32.xlu0 %v948_v15, 272  ;;  %844 = vperm.xlu1 %2806, %v785_v42  }
 0x19d   :  { %1056 = vbcast.lane.b32.xlu0 %v1053_v41, 256  ;;  %955 = vbcast.lane.b32.xlu1 %v948_v15, 264 }
 0x1a1   :  { %1064 = vbcast.lane.b32.xlu0 %v1053_v41, 272  ;;  %963 = vbcast.lane.b32.xlu1 %v948_v15, 280 }
 0x1a5   :  { %1161 = vbcast.lane.b32.xlu0 %v1158_v40, 256  ;;  %1060 = vbcast.lane.b32.xlu1 %v1053_v41, 264 }
 0x1a9   :  { %1169 = vbcast.lane.b32.xlu0 %v1158_v40, 272  ;;  %1068 = vbcast.lane.b32.xlu1 %v1053_v41, 280 }
 0x1ad   :  { %1266 = vbcast.lane.b32.xlu0 %v1263_v46, 256  ;;  %1165 = vbcast.lane.b32.xlu1 %v1158_v40, 264 }
 0x1b1   :  { %1274 = vbcast.lane.b32.xlu0 %v1263_v46, 272  ;;  %1173 = vbcast.lane.b32.xlu1 %v1158_v40, 280 }
 0x1b5   :  { %1906 = vbcast.lane.b32.xlu0 %v1903_v51, 256  ;;  %1270 = vbcast.lane.b32.xlu1 %v1263_v46, 264 }
 0x1b9   :  { %1914 = vbcast.lane.b32.xlu0 %v1903_v51, 272  ;;  %1278 = vbcast.lane.b32.xlu1 %v1263_v46, 280 }
 0x1bd   :  { %2011 = vbcast.lane.b32.xlu0 %v2008_v33, 256  ;;  %1910 = vbcast.lane.b32.xlu1 %v1903_v51, 264 }
 0x1c1   :  { %2019 = vbcast.lane.b32.xlu0 %v2008_v33, 272  ;;  %1918 = vbcast.lane.b32.xlu1 %v1903_v51, 280 }
 0x1c5   :  { %2116 = vbcast.lane.b32.xlu0 %v2113_v43, 256  ;;  %2015 = vbcast.lane.b32.xlu1 %v2008_v33, 264 }
 0x1c9   :  { %2124 = vbcast.lane.b32.xlu0 %v2113_v43, 272  ;;  %2023 = vbcast.lane.b32.xlu1 %v2008_v33, 280 }
 0x1cd   :  { %2221 = vbcast.lane.b32.xlu0 %v2218_v32, 256  ;;  %2120 = vbcast.lane.b32.xlu1 %v2113_v43, 264 }
 0x1d1   :  { %2229 = vbcast.lane.b32.xlu0 %v2218_v32, 272  ;;  %2128 = vbcast.lane.b32.xlu1 %v2113_v43, 280 }
 0x1d5   :  { %2225 = vbcast.lane.b32.xlu1 %v2218_v32, 264 }
 0x1d9   :  { %2233 = vbcast.lane.b32.xlu1 %v2218_v32, 280 }
 0x1f8   :  { %v3212_v30 = vpop.permute.xlu0 %805 }
 0x1f9   :  { %4110 = vst [vmem:[#allocation41_spill] sm:$0xff] %v3212_v30 }
 0x1fc   :  { %v3214_v49 = vpop.permute.xlu0 %811 }
 0x1fd   :  { %4111 = vst [vmem:[#allocation42_spill] sm:$0xff] %v3214_v49 }
 0x200   :  { %v3216_v15 = vpop.permute.xlu0 %817  ;;  %v3218_v1 = vpop.permute.xlu1 %808 }
 0x201   :  { %4112 = vst [vmem:[#allocation43_spill] sm:$0xff] %v3216_v15  ;;  %4113 = vst [vmem:[#allocation44_spill] sm:$0xff] %v3218_v1 }
 0x204   :  { %v3220_v42 = vpop.permute.xlu0 %823  ;;  %v3222_v41 = vpop.permute.xlu1 %814 }
 0x205   :  { %4114 = vst [vmem:[#allocation45_spill] sm:$0xff] %v3220_v42  ;;  %4115 = vst [vmem:[#allocation46_spill] sm:$0xff] %v3222_v41 }
 0x208   :  { %v3224_v40 = vpop.permute.xlu0 %829  ;;  %v3226_v46 = vpop.permute.xlu1 %820 }
 0x209   :  { %4116 = vst [vmem:[#allocation47_spill] sm:$0xff] %v3224_v40  ;;  %4117 = vst [vmem:[#allocation48_spill] sm:$0xff] %v3226_v46 }
 0x20c   :  { %v3228_v31 = vpop.permute.xlu0 %835  ;;  %v3230_v51 = vpop.permute.xlu1 %826 }
 0x20d   :  { %4118 = vst [vmem:[#allocation49_spill] sm:$0xff] %v3228_v31  ;;  %4119 = vst [vmem:[#allocation50_spill] sm:$0xff] %v3230_v51 }
 0x210   :  { %v3232_v33 = vpop.permute.xlu0 %841  ;;  %v3234_v43 = vpop.permute.xlu1 %832 }
 0x211   :  { %4120 = vst [vmem:[#allocation51_spill] sm:$0xff] %v3232_v33  ;;  %4121 = vst [vmem:[#allocation52_spill] sm:$0xff] %v3234_v43 }
 0x214   :  { %v952_v32 = vpop.permute.xlu0 %951  ;;  %v3236_v45 = vpop.permute.xlu1 %838 }
 0x215   :  { %4122 = vst [vmem:[#allocation53_spill] sm:$0xff] %v3236_v45  ;;  %v969_v18 = vmul.f32 %v952_v32, %v2997_v26  ;;  %v973_v42 = vmul.f32 %v952_v32, %v3007_v36 }
 0x217   :  { %986 = vperm.xlu0 %2807, %v969_v18  }
 0x218   :  { %v3240_v15 = vpop.permute.xlu1 %844  ;;  %v960_v49 = vpop.permute.xlu0 %959 }
 0x219   :  { %4123 = vst [vmem:[#allocation54_spill] sm:$0xff] %v3240_v15  ;;  %v971_v46 = vmul.f32 %v960_v49, %v2997_v26  ;;  %v975_v18 = vmul.f32 %v960_v49, %v3007_v36 }
 0x21b   :  { %998 = vperm.xlu0 %2807, %v973_v42  }
 0x21c   :  { %v956_v31 = vpop.permute.xlu1 %955  ;;  %v1057_v41 = vpop.permute.xlu0 %1056 }
 0x21d   :  { %v970_v51 = vmul.f32 %v956_v31, %v2997_v26  ;;  %v974_v40 = vmul.f32 %v956_v31, %v3007_v36  ;;  %v1074_v32 = vmul.f32 %v1057_v41, %v3021_v50  ;;  %v1078_v15 = vmul.f32 %v1057_v41, %v3033_v0 }
 0x21f   :  { %992 = vperm.xlu0 %2807, %v971_v46   ;;  %989 = vperm.xlu1 %2806, %v970_v51  }
 0x220   :  { %v964_v33 = vpop.permute.xlu1 %963  ;;  %v1065_v51 = vpop.permute.xlu0 %1064 }
 0x221   :  { %v972_v45 = vmul.f32 %v964_v33, %v2997_v26  ;;  %v976_v46 = vmul.f32 %v964_v33, %v3007_v36  ;;  %v1076_v31 = vmul.f32 %v1065_v51, %v3021_v50  ;;  %v1080_v41 = vmul.f32 %v1065_v51, %v3033_v0 }
 0x223   :  { %1001 = vperm.xlu1 %2806, %v974_v40   ;;  %995 = vperm.xlu0 %2807, %v972_v45  }
 0x224   :  { %v1061_v42 = vpop.permute.xlu1 %1060 }
 0x225   :  { %v1075_v43 = vmul.f32 %v1061_v42, %v3021_v50  ;;  %v1079_v45 = vmul.f32 %v1061_v42, %v3033_v0 }
 0x227   :  { %1004 = vperm.xlu1 %2806, %v975_v18   ;;  %1091 = vperm.xlu0 %2807, %v1074_v32   ;;  %v1162_v18 = vpop.permute.xlu0 %1161 }
 0x228   :  { %v1069_v40 = vpop.permute.xlu1 %1068  ;;  %v1179_v33 = vmul.f32 %v1162_v18, %v3045_v19  ;;  %v1183_v32 = vmul.f32 %v1162_v18, %v3057_v37 }
 0x229   :  { %v1077_v49 = vmul.f32 %v1069_v40, %v3021_v50 }
 0x22b   :  { %1007 = vperm.xlu1 %2806, %v976_v46   ;;  %1103 = vperm.xlu0 %2807, %v1078_v15   ;;  %v1081_v46 = vmul.f32 %v1069_v40, %v3033_v0 }
 0x22c   :  { %v1166_v15 = vpop.permute.xlu1 %1165 }
 0x22d   :  { %v1184_v51 = vmul.f32 %v1166_v15, %v3057_v37 }
 0x22f   :  { %1094 = vperm.xlu1 %2806, %v1075_v43   ;;  %1097 = vperm.xlu0 %2807, %v1076_v31   ;;  %v1170_v43 = vpop.permute.xlu0 %1169  ;;  %v1180_v31 = vmul.f32 %v1166_v15, %v3045_v19 }
 0x230   :  { %v1181_v42 = vmul.f32 %v1170_v43, %v3045_v19  ;;  %v1185_v18 = vmul.f32 %v1170_v43, %v3057_v37 }
 0x233   :  { %1106 = vperm.xlu1 %2806, %v1079_v45   ;;  %1100 = vperm.xlu0 %2807, %v1077_v49   ;;  %v1174_v45 = vpop.permute.xlu1 %1173 }
 0x234   :  { %v1182_v49 = vmul.f32 %v1174_v45, %v3045_v19 }
 0x237   :  { %1109 = vperm.xlu1 %2806, %v1080_v41   ;;  %1196 = vperm.xlu0 %2807, %v1179_v33   ;;  %v1267_v41 = vpop.permute.xlu0 %1266  ;;  %v1271_v33 = vpop.permute.xlu1 %1270 }
 0x238   :  { %v1284_v40 = vmul.f32 %v1267_v41, %v3168_v48  ;;  %v1289_v43 = vmul.f32 %v1271_v33, %v3185_v35 }
 0x23b   :  { %1112 = vperm.xlu1 %2806, %v1081_v46   ;;  %1208 = vperm.xlu0 %2807, %v1183_v32   ;;  %v1288_v32 = vmul.f32 %v1267_v41, %v3185_v35  ;;  %v1186_v46 = vmul.f32 %v1174_v45, %v3057_v37 }
 0x23f   :  { %1199 = vperm.xlu1 %2806, %v1180_v31   ;;  %1202 = vperm.xlu0 %2807, %v1181_v42   ;;  %v1275_v31 = vpop.permute.xlu0 %1274  ;;  %v1285_v42 = vmul.f32 %v1271_v33, %v3168_v48 }
 0x240   :  { %v1286_v15 = vmul.f32 %v1275_v31, %v3168_v48  ;;  %v1290_v41 = vmul.f32 %v1275_v31, %v3185_v35 }
 0x243   :  { %1211 = vperm.xlu1 %2806, %v1184_v51   ;;  %1205 = vperm.xlu0 %2807, %v1182_v49   ;;  %v1279_v51 = vpop.permute.xlu1 %1278 }
 0x244   :  { %v1287_v49 = vmul.f32 %v1279_v51, %v3168_v48 }
 0x247   :  { %1214 = vperm.xlu1 %2806, %v1185_v18   ;;  %1301 = vperm.xlu0 %2807, %v1284_v40   ;;  %v1907_v18 = vpop.permute.xlu0 %1906  ;;  %v1911_v40 = vpop.permute.xlu1 %1910 }
 0x248   :  { %v1924_v45 = vmul.f32 %v1907_v18, %v2997_v26  ;;  %v1929_v31 = vmul.f32 %v1911_v40, %v3007_v36 }
 0x24b   :  { %1217 = vperm.xlu1 %2806, %v1186_v46   ;;  %1313 = vperm.xlu0 %2807, %v1288_v32   ;;  %v1928_v32 = vmul.f32 %v1907_v18, %v3007_v36  ;;  %v1291_v46 = vmul.f32 %v1279_v51, %v3185_v35 }
 0x24f   :  { %1304 = vperm.xlu1 %2806, %v1285_v42   ;;  %1307 = vperm.xlu0 %2807, %v1286_v15   ;;  %v1915_v42 = vpop.permute.xlu0 %1914  ;;  %v1925_v15 = vmul.f32 %v1911_v40, %v2997_v26 }
 0x250   :  { %v1926_v33 = vmul.f32 %v1915_v42, %v2997_v26  ;;  %v1930_v18 = vmul.f32 %v1915_v42, %v3007_v36 }
 0x253   :  { %1316 = vperm.xlu1 %2806, %v1289_v43   ;;  %1310 = vperm.xlu0 %2807, %v1287_v49   ;;  %v1919_v43 = vpop.permute.xlu1 %1918 }
 0x254   :  { %v1927_v49 = vmul.f32 %v1919_v43, %v2997_v26 }
 0x257   :  { %1319 = vperm.xlu1 %2806, %v1290_v41   ;;  %1941 = vperm.xlu0 %2807, %v1924_v45   ;;  %v2012_v41 = vpop.permute.xlu0 %2011  ;;  %v2016_v45 = vpop.permute.xlu1 %2015 }
 0x258   :  { %v2029_v51 = vmul.f32 %v2012_v41, %v3021_v50  ;;  %v2030_v26 = vmul.f32 %v2016_v45, %v3021_v50  ;;  %v2034_v42 = vmul.f32 %v2016_v45, %v3033_v0 }
 0x25b   :  { %1322 = vperm.xlu1 %2806, %v1291_v46   ;;  %1953 = vperm.xlu0 %2807, %v1928_v32   ;;  %v2033_v32 = vmul.f32 %v2012_v41, %v3033_v0  ;;  %v1931_v46 = vmul.f32 %v1919_v43, %v3007_v36 }
 0x25f   :  { %1944 = vperm.xlu1 %2806, %v1925_v15   ;;  %1947 = vperm.xlu0 %2807, %v1926_v33   ;;  %v2020_v15 = vpop.permute.xlu0 %2019  ;;  %v2024_v33 = vpop.permute.xlu1 %2023 }
 0x260   :  { %v2031_v40 = vmul.f32 %v2020_v15, %v3021_v50  ;;  %v2035_v41 = vmul.f32 %v2020_v15, %v3033_v0 }
 0x263   :  { %1956 = vperm.xlu1 %2806, %v1929_v31   ;;  %1950 = vperm.xlu0 %2807, %v1927_v49   ;;  %v2032_v31 = vmul.f32 %v2024_v33, %v3021_v50  ;;  %v2117_v49 = vpop.permute.xlu0 %2116  ;;  %v2121_v43 = vpop.permute.xlu1 %2120 }
 0x264   :  { %v2134_v36 = vmul.f32 %v2117_v49, %v3045_v19  ;;  %v2135_v50 = vmul.f32 %v2121_v43, %v3045_v19  ;;  %v2139_v15 = vmul.f32 %v2121_v43, %v3057_v37 }
 0x267   :  { %1959 = vperm.xlu1 %2806, %v1930_v18   ;;  %2046 = vperm.xlu0 %2807, %v2029_v51   ;;  %v2138_v18 = vmul.f32 %v2117_v49, %v3057_v37  ;;  %v2036_v51 = vmul.f32 %v2024_v33, %v3033_v0 }
 0x26b   :  { %1962 = vperm.xlu1 %2806, %v1931_v46   ;;  %2058 = vperm.xlu0 %2807, %v2033_v32   ;;  %v2125_v32 = vpop.permute.xlu0 %2124  ;;  %v2129_v46 = vpop.permute.xlu1 %2128 }
 0x26c   :  { %v2136_v45 = vmul.f32 %v2125_v32, %v3045_v19  ;;  %v2141_v49 = vmul.f32 %v2129_v46, %v3057_v37 }
 0x26f   :  { %2049 = vperm.xlu1 %2806, %v2030_v26   ;;  %2052 = vperm.xlu0 %2807, %v2031_v40   ;;  %v2137_v40 = vmul.f32 %v2129_v46, %v3045_v19  ;;  %v2222_v26 = vpop.permute.xlu0 %2221  ;;  %v2226_v33 = vpop.permute.xlu1 %2225 }
 0x270   :  { %v2239_v0 = vmul.f32 %v2222_v26, %v3168_v48  ;;  %v2240_v19 = vmul.f32 %v2226_v33, %v3168_v48 }
 0x273   :  { %2061 = vperm.xlu1 %2806, %v2034_v42   ;;  %2055 = vperm.xlu0 %2807, %v2032_v31   ;;  %v2140_v42 = vmul.f32 %v2125_v32, %v3057_v37  ;;  %v2243_v31 = vmul.f32 %v2222_v26, %v3185_v35  ;;  %v2234_v43 = vpop.permute.xlu1 %2233 }
 0x274   :  { %v2246_v37 = vmul.f32 %v2234_v43, %v3185_v35 }
 0x277   :  { %2064 = vperm.xlu1 %2806, %v2035_v41   ;;  %2151 = vperm.xlu0 %2807, %v2134_v36   ;;  %v2230_v41 = vpop.permute.xlu0 %2229 }
 0x278   :  { %v2241_v36 = vmul.f32 %v2230_v41, %v3168_v48  ;;  %v2245_v32 = vmul.f32 %v2230_v41, %v3185_v35 }
 0x27b   :  { %2067 = vperm.xlu1 %2806, %v2036_v51   ;;  %2163 = vperm.xlu0 %2807, %v2138_v18   ;;  %v2244_v18 = vmul.f32 %v2226_v33, %v3185_v35  ;;  %v2242_v51 = vmul.f32 %v2234_v43, %v3168_v48 }
 0x27f   :  { %2154 = vperm.xlu1 %2806, %v2135_v50   ;;  %2157 = vperm.xlu0 %2807, %v2136_v45  }
 0x283   :  { %2166 = vperm.xlu1 %2806, %v2139_v15   ;;  %2160 = vperm.xlu0 %2807, %v2137_v40  }
 0x287   :  { %2169 = vperm.xlu1 %2806, %v2140_v42   ;;  %2256 = vperm.xlu0 %2807, %v2239_v0  }
 0x28b   :  { %2172 = vperm.xlu1 %2806, %v2141_v49   ;;  %2268 = vperm.xlu0 %2807, %v2243_v31  }
 0x28f   :  { %2259 = vperm.xlu1 %2806, %v2240_v19   ;;  %2262 = vperm.xlu0 %2807, %v2241_v36  }
 0x293   :  { %2271 = vperm.xlu1 %2806, %v2244_v18   ;;  %2265 = vperm.xlu0 %2807, %v2242_v51  }
 0x296   :  { %v987_v45 = vpop.permute.xlu0 %986 }
 0x297   :  { %2274 = vperm.xlu1 %2806, %v2245_v32   ;;  %v4124_v32 = vlaneseq }
 0x29a   :  { %v999_v50 = vpop.permute.xlu0 %998 }
 0x29b   :  { %2277 = vperm.xlu1 %2806, %v2246_v37   ;;  %v3315_v37 = vand.u32 127, %v4124_v32 }
 0x29d   :  { %v202_v38 = vadd.s32 4294967288, %v3315_v37  ;;  %v209_v28 = vadd.s32 4294967280, %v3315_v37  ;;  %v216_v11 = vadd.s32 4294967272, %v3315_v37  ;;  %v3334_v9 = vsub.s32 %v3315_v37, %v2969_v6 }
 0x29e   :  { %v993_v46 = vpop.permute.xlu0 %992  ;;  %v990_v15 = vpop.permute.xlu1 %989 }
 0x29f   :  { %v3325_v39 = vsub.s32 %v202_v38, %v2969_v6  ;;  %v3330_v32 = vsub.s32 %v209_v28, %v2969_v6  ;;  %v3337_v44 = vsub.s32 %v216_v11, %v2969_v6  ;;  %v1012_v63 = vrot.slane %v987_v45, %v3334_v9 }
 0x2a0   :  { %v1031_v7 = vrot.slane %v999_v50, %v3334_v9 }
 0x2a1   :  { %v1016_v29 = vrot.slane %v990_v15, %v3325_v39  ;;  %v1021_v11 = vrot.slane %v993_v46, %v3330_v32 }
 0x2a2   :  { %v1002_v40 = vpop.permute.xlu1 %1001  ;;  %v996_v26 = vpop.permute.xlu0 %995 }
 0x2a3   :  { %v1035_v17 = vrot.slane %v1002_v40, %v3325_v39  ;;  %v1017_v55 = vsel %vm207_vm1, %v1016_v29, %v1012_v63  ;;  %v1026_v40 = vrot.slane %v996_v26, %v3337_v44  ;;  %v2890_v29 = vmov 1966171168  }
 0x2a4   :  { %v1022_v46 = vsel %vm214_vm2, %v1021_v11, %v1017_v55 }
 0x2a5   :  { %v1036_v15 = vsel %vm207_vm1, %v1035_v17, %v1031_v7  ;;  %v1367_v7 = vunpack.c.l.s4 %v2890_v29  ;;  %v1027_v17 = vsel %vm221_vm3, %v1026_v40, %v1022_v46 }
 0x2a6   :  { %v1005_v42 = vpop.permute.xlu1 %1004  ;;  %v1092_v0 = vpop.permute.xlu0 %1091 }
 0x2a7   :  { %v1040_v38 = vrot.slane %v1005_v42, %v3330_v32  ;;  %v1117_v26 = vrot.slane %v1092_v0, %v3334_v9 }
 0x2a9   :  { %v1041_v45 = vsel %vm214_vm2, %v1040_v38, %v1036_v15 }
 0x2aa   :  { %v1008_v31 = vpop.permute.xlu1 %1007  ;;  %v1104_v33 = vpop.permute.xlu0 %1103 }
 0x2ab   :  { %v1045_v28 = vrot.slane %v1008_v31, %v3337_v44  ;;  %v1136_v38 = vrot.slane %v1104_v33, %v3334_v9 }
 0x2ad   :  { %v1046_v50 = vsel %vm221_vm3, %v1045_v28, %v1041_v45  ;;  %v2774_v45 = vld [vmem:[%s4059_s4] ss:$0 sm:$0xff] }
 0x2ae   :  { %v1095_v49 = vpop.permute.xlu1 %1094  ;;  %v3304_v48 = vpop.permute.xlu0 %1097 }
 0x2af   :  { %v1121_v42 = vrot.slane %v1095_v49, %v3325_v39  ;;  %v1126_v28 = vrot.slane %v3304_v48, %v3330_v32 }
 0x2b1   :  { %v1122_v11 = vsel %vm207_vm1, %v1121_v42, %v1117_v26  ;;  %v1368_v26 = vunpack.c.0.s8 %v1367_v7 }
 0x2b2   :  { %v1107_v36 = vpop.permute.xlu1 %1106  ;;  %v3306_v19 = vpop.permute.xlu0 %1100  ;;  %v1127_v29 = vsel %vm214_vm2, %v1126_v28, %v1122_v11 }
 0x2b3   :  { %v1140_v31 = vrot.slane %v1107_v36, %v3325_v39  ;;  %v1047_v36 = vsel %vm290_vm4, %v1046_v50, %v1027_v17  ;;  %v1131_v0 = vrot.slane %v3306_v19, %v3337_v44 }
 0x2b5   :  { %v1141_v15 = vsel %vm207_vm1, %v1140_v31, %v1136_v38 }
 0x2b6   :  { %v1110_v41 = vpop.permute.xlu1 %1109  ;;  %v3308_v18 = vpop.permute.xlu0 %1196 }
 0x2b7   :  { %v1145_v63 = vrot.slane %v1110_v41, %v3330_v32 }
 0x2b9   :  { %v1146_v48 = vsel %vm214_vm2, %v1145_v63, %v1141_v15 }
 0x2ba   :  { %v3310_v43 = vpop.permute.xlu1 %1112  ;;  %v3312_v51 = vpop.permute.xlu0 %1208 }
 0x2bb   :  { %v1150_v49 = vrot.slane %v3310_v43, %v3337_v44 }
 0x2bd   :  { %v1151_v19 = vsel %vm221_vm3, %v1150_v49, %v1146_v48 }
 0x2be   :  { %v1200_v30 = vpop.permute.xlu1 %1199  ;;  %v3317_v1 = vpop.permute.xlu0 %1202 }
 0x2bf   :  { %v1226_v55 = vrot.slane %v1200_v30, %v3325_v39  ;;  %v1241_v30 = vrot.slane %v3312_v51, %v3334_v9 }
 0x2c2   :  { %v1212_v24 = vpop.permute.xlu1 %1211  ;;  %v3320_v47 = vpop.permute.xlu0 %1205 }
 0x2c3   :  { %v1245_v41 = vrot.slane %v1212_v24, %v3325_v39  ;;  %v1222_v24 = vrot.slane %v3308_v18, %v3334_v9  ;;  %v1236_v46 = vrot.slane %v3320_v47, %v3337_v44  ;;  %v1049_v18 = vadd.f32 %v2774_v45, %v1047_v36 }
 0x2c5   :  { %v1227_v42 = vsel %vm207_vm1, %v1226_v55, %v1222_v24  ;;  %v1246_v31 = vsel %vm207_vm1, %v1245_v41, %v1241_v30 }
 0x2c6   :  { %v1215_v34 = vpop.permute.xlu1 %1214  ;;  %v3327_v22 = vpop.permute.xlu0 %1301 }
 0x2c7   :  { %v1250_v33 = vrot.slane %v1215_v34, %v3330_v32  ;;  %v1231_v34 = vrot.slane %v3317_v1, %v3330_v32  ;;  %v1132_v1 = vsel %vm221_vm3, %v1131_v0, %v1127_v29  ;;  %v1327_v38 = vrot.slane %v3327_v22, %v3334_v9 }
 0x2c9   :  { %v1251_v51 = vsel %vm214_vm2, %v1250_v33, %v1246_v31  ;;  %v1232_v36 = vsel %vm214_vm2, %v1231_v34, %v1227_v42 }
 0x2ca   :  { %v1218_v60 = vpop.permute.xlu1 %1217  ;;  %v3345_v20 = vpop.permute.xlu0 %1313  ;;  %v1237_v41 = vsel %vm221_vm3, %v1236_v46, %v1232_v36 }
 0x2cb   :  { %v1255_v50 = vrot.slane %v1218_v60, %v3337_v44  ;;  %v1346_v7 = vrot.slane %v3345_v20, %v3334_v9 }
 0x2cd   :  { %v1256_v49 = vsel %vm221_vm3, %v1255_v50, %v1251_v51 }
 0x2ce   :  { %v1305_v27 = vpop.permute.xlu1 %1304  ;;  %v1308_v5 = vpop.permute.xlu0 %1307  ;;  %v1257_v15 = vsel %vm290_vm4, %v1256_v49, %v1237_v41 }
 0x2cf   :  { %v1331_v63 = vrot.slane %v1305_v27, %v3325_v39  ;;  %v1152_v27 = vsel %vm290_vm4, %v1151_v19, %v1132_v1  ;;  %v1336_v28 = vrot.slane %v1308_v5, %v3330_v32 }
 0x2d1   :  { %v1332_v11 = vsel %vm207_vm1, %v1331_v63, %v1327_v38 }
 0x2d2   :  { %v1317_v40 = vpop.permute.xlu1 %1316  ;;  %v1311_v43 = vpop.permute.xlu0 %1310  ;;  %v1337_v48 = vsel %vm214_vm2, %v1336_v28, %v1332_v11 }
 0x2d3   :  { %v1350_v47 = vrot.slane %v1317_v40, %v3325_v39  ;;  %v1341_v22 = vrot.slane %v1311_v43, %v3337_v44  ;;  %v1154_v40 = vadd.f32 %v1152_v27, %v1049_v18  ;;  %v3415_v43 = vsub.s32 %v1368_v26, %v2969_v6 }
 0x2d5   :  { %v1351_v45 = vsel %vm207_vm1, %v1350_v47, %v1346_v7  ;;  %v1259_v30 = vadd.f32 %v1257_v15, %v1154_v40  ;;  %v1342_v20 = vsel %vm221_vm3, %v1341_v22, %v1337_v48 }
 0x2d6   :  { %v1320_v60 = vpop.permute.xlu1 %1319  ;;  %v3391_v17 = vpop.permute.xlu0 %1941 }
 0x2d7   :  { %v1355_v55 = vrot.slane %v1320_v60, %v3330_v32  ;;  %v3423_v60 = vld [vmem:[%s4060_s5] sm:$0xf] }
 0x2d9   :  { %v1356_v24 = vsel %vm214_vm2, %v1355_v55, %v1351_v45 }
 0x2da   :  { %v1323_v0 = vpop.permute.xlu1 %1322  ;;  %v1954_v33 = vpop.permute.xlu0 %1953 }
 0x2db   :  { %v1360_v5 = vrot.slane %v1323_v0, %v3337_v44 }
 0x2dd   :  { %v1361_v50 = vsel %vm221_vm3, %v1360_v5, %v1356_v24 }
 0x2de   :  { %v1362_v19 = vsel %vm290_vm4, %v1361_v50, %v1342_v20  ;;  %v1945_v34 = vpop.permute.xlu1 %1944  ;;  %v1948_v42 = vpop.permute.xlu0 %1947 }
 0x2df   :  { %v1364_v31 = vadd.f32 %v1362_v19, %v1259_v30 }
 0x2e1   :  { %v1372_v46 = vrot.slane %v1364_v31, %v3415_v43 }
 0x2e2   :  { %v1957_v63 = vpop.permute.xlu1 %1956  ;;  %v1951_v18 = vpop.permute.xlu0 %1950 }
 0x2e3   :  { %v1380_v29 = vrot.slane %v1372_v46, %v3415_v43  ;;  %v1373_v51 = vcombine.high %v1372_v46, %v1372_v46 }
 0x2e5   :  { %v1391_v26 = vrot.slane %v1380_v29, %v2977_v12  ;;  %v1387_v1 = vrot.slane %v1373_v51, %v3415_v43  ;;  %v1971_v51 = vrot.slane %v1945_v34, %v3325_v39  ;;  %v1981_v34 = vrot.slane %v1951_v18, %v3337_v44 }
 0x2e6   :  { %v1960_v38 = vpop.permute.xlu1 %1959  ;;  %v2047_v49 = vpop.permute.xlu0 %2046 }
 0x2e7   :  { %v1398_v47 = vsub.f32 %v1391_v26, %v3423_v60  ;;  %v1395_v27 = vrot.slane %v1387_v1, %v2977_v12  ;;  %v1990_v26 = vrot.slane %v1957_v63, %v3325_v39  ;;  %v1995_v1 = vrot.slane %v1960_v38, %v3330_v32 }
 0x2e9   :  { %v1400_v36 = vmul.f32 %v1398_v47, %v1398_v47  ;;  %v1399_v28 = vsub.f32 %v1395_v27, %v3423_v60  ;;  %v1967_v47 = vrot.slane %v3391_v17, %v3334_v9  ;;  %v1986_v27 = vrot.slane %v1954_v33, %v3334_v9 }
 0x2ea   :  { %v1963_v55 = vpop.permute.xlu1 %1962  ;;  %v2059_v41 = vpop.permute.xlu0 %2058 }
 0x2eb   :  { %v1403_v7 = vsel %vm1402_vm5, %v1400_v36, 0.0  ;;  %v1401_v11 = vmul.f32 %v1399_v28, %v1399_v28  ;;  %v2000_v36 = vrot.slane %v1963_v55, %v3337_v44  ;;  %v1991_v13 = vsel %vm207_vm1, %v1990_v26, %v1986_v27 }
 0x2ec   :  { %1404 = vadd.xlane.f32.xlu0 %v1403_v7  ;;  %v1996_v63 = vsel %vm214_vm2, %v1995_v1, %v1991_v13  ;;  %v2091_v26 = vrot.slane %v2059_v41, %v3334_v9 }
 0x2ed   :  { %v1406_v22 = vsel %vm1402_vm5, %v1401_v11, 0.0  ;;  %v1976_v11 = vrot.slane %v1948_v42, %v3330_v32  ;;  %v2001_v38 = vsel %vm221_vm3, %v2000_v36, %v1996_v63 }
 0x2ee   :  { %v2050_v15 = vpop.permute.xlu1 %2049  ;;  %1407 = vadd.xlane.f32.xlu1 %v1406_v22  ;;  %v2053_v0 = vpop.permute.xlu0 %2052  ;;  %v1972_v22 = vsel %vm207_vm1, %v1971_v51, %v1967_v47  ;;  %v2072_v51 = vrot.slane %v2047_v49, %v3334_v9 }
 0x2ef   :  { %v2076_v17 = vrot.slane %v2050_v15, %v3325_v39  ;;  %v1977_v55 = vsel %vm214_vm2, %v1976_v11, %v1972_v22  ;;  %v2081_v15 = vrot.slane %v2053_v0, %v3330_v32 }
 0x2f0   :  { %v1982_v42 = vsel %vm221_vm3, %v1981_v34, %v1977_v55 }
 0x2f1   :  { %v2002_v1 = vsel %vm290_vm4, %v2001_v38, %v1982_v42  ;;  %v2077_v27 = vsel %vm207_vm1, %v2076_v17, %v2072_v51 }
 0x2f2   :  { %v2062_v40 = vpop.permute.xlu1 %2061  ;;  %v2056_v45 = vpop.permute.xlu0 %2055 }
 0x2f3   :  { %v2095_v33 = vrot.slane %v2062_v40, %v3325_v39  ;;  %v2086_v36 = vrot.slane %v2056_v45, %v3337_v44 }
 0x2f6   :  { %v2065_v5 = vpop.permute.xlu1 %2064  ;;  %v2152_v48 = vpop.permute.xlu0 %2151 }
 0x2f7   :  { %v2100_v14 = vrot.slane %v2065_v5, %v3330_v32  ;;  %v2096_v5 = vsel %vm207_vm1, %v2095_v33, %v2091_v26  ;;  %v2177_v0 = vrot.slane %v2152_v48, %v3334_v9 }
 0x2f9   :  { %v2101_v11 = vsel %vm214_vm2, %v2100_v14, %v2096_v5  ;;  %v2082_v14 = vsel %vm214_vm2, %v2081_v15, %v2077_v27 }
 0x2fa   :  { %v2068_v24 = vpop.permute.xlu1 %2067  ;;  %v2164_v30 = vpop.permute.xlu0 %2163 }
 0x2fb   :  { %v2105_v18 = vrot.slane %v2068_v24, %v3337_v44  ;;  %v2784_v24 = vld [vmem:[%s4059_s4 + $0x1] ss:$0 sm:$0xff] }
 0x2fc   :  { %v2004_v17 = vadd.f32 %v2784_v24, %v2002_v1 }
 0x2fd   :  { %v2106_v22 = vsel %vm221_vm3, %v2105_v18, %v2101_v11 }
 0x2fe   :  { %v2155_v20 = vpop.permute.xlu1 %2154  ;;  %v2158_v50 = vpop.permute.xlu0 %2157 }
 0x2ff   :  { %v2181_v40 = vrot.slane %v2155_v20, %v3325_v39  ;;  %v2196_v20 = vrot.slane %v2164_v30, %v3334_v9  ;;  %v2186_v34 = vrot.slane %v2158_v50, %v3330_v32 }
 0x301   :  { %v2182_v45 = vsel %vm207_vm1, %v2181_v40, %v2177_v0 }
 0x302   :  { %v2167_v19 = vpop.permute.xlu1 %2166  ;;  %v2161_v31 = vpop.permute.xlu0 %2160 }
 0x303   :  { %v2200_v47 = vrot.slane %v2167_v19, %v3325_v39  ;;  %v2191_v63 = vrot.slane %v2161_v31, %v3337_v44  ;;  %v2187_v31 = vsel %vm214_vm2, %v2186_v34, %v2182_v45 }
 0x305   :  { %v2192_v18 = vsel %vm221_vm3, %v2191_v63, %v2187_v31 }
 0x306   :  { %v2170_v46 = vpop.permute.xlu1 %2169  ;;  %v2257_v29 = vpop.permute.xlu0 %2256 }
 0x307   :  { %v2205_v49 = vrot.slane %v2170_v46, %v3330_v32  ;;  %v2201_v46 = vsel %vm207_vm1, %v2200_v47, %v2196_v20  ;;  %v2282_v55 = vrot.slane %v2257_v29, %v3334_v9 }
 0x309   :  { %v2206_v48 = vsel %vm214_vm2, %v2205_v49, %v2201_v46 }
 0x30a   :  { %v2173_v28 = vpop.permute.xlu1 %2172  ;;  %v2269_v7 = vpop.permute.xlu0 %2268 }
 0x30b   :  { %v2210_v19 = vrot.slane %v2173_v28, %v3337_v44  ;;  %v2087_v28 = vsel %vm221_vm3, %v2086_v36, %v2082_v14  ;;  %v2301_v1 = vrot.slane %v2269_v7, %v3334_v9 }
 0x30c   :  { %v2107_v51 = vsel %vm290_vm4, %v2106_v22, %v2087_v28 }
 0x30d   :  { %v2211_v50 = vsel %vm221_vm3, %v2210_v19, %v2206_v48  ;;  %v2109_v27 = vadd.f32 %v2107_v51, %v2004_v17 }
 0x30e   :  { %v2260_v61 = vpop.permute.xlu1 %2259  ;;  %v2263_v13 = vpop.permute.xlu0 %2262  ;;  %v2212_v40 = vsel %vm290_vm4, %v2211_v50, %v2192_v18 }
 0x30f   :  { %v2286_v38 = vrot.slane %v2260_v61, %v3325_v39  ;;  %v2291_v61 = vrot.slane %v2263_v13, %v3330_v32 }
 0x311   :  { %v2287_v15 = vsel %vm207_vm1, %v2286_v38, %v2282_v55 }
 0x312   :  { %v2272_v41 = vpop.permute.xlu1 %2271  ;;  %v2266_v30 = vpop.permute.xlu0 %2265  ;;  %v2292_v13 = vsel %vm214_vm2, %v2291_v61, %v2287_v15 }
 0x313   :  { %v2305_v42 = vrot.slane %v2272_v41, %v3325_v39  ;;  %v2296_v29 = vrot.slane %v2266_v30, %v3337_v44  ;;  %v2214_v41 = vadd.f32 %v2212_v40, %v2109_v27 }
 0x315   :  { %v2306_v5 = vsel %vm207_vm1, %v2305_v42, %v2301_v1  ;;  %v2297_v24 = vsel %vm221_vm3, %v2296_v29, %v2292_v13 }
 0x316   :  { %v2275_v33 = vpop.permute.xlu1 %2274 }
 0x317   :  { %v2310_v26 = vrot.slane %v2275_v33, %v3330_v32 }
 0x319   :  { %v2311_v49 = vsel %vm214_vm2, %v2310_v26, %v2306_v5 }
 0x31a   :  { %v2278_v47 = vpop.permute.xlu1 %2277 }
 0x31b   :  { %v2315_v36 = vrot.slane %v2278_v47, %v3337_v44 }
 0x31d   :  { %v2316_v7 = vsel %vm221_vm3, %v2315_v36, %v2311_v49 }
 0x31e   :  { %v2317_v11 = vsel %vm290_vm4, %v2316_v7, %v2297_v24 }
 0x31f   :  { %v2319_v0 = vadd.f32 %v2317_v11, %v2214_v41  ;;  %v786_v11 = vmul.f32 %v3178_v25, %v3185_v35  ;;  %v787_v25 = vmul.f32 %v3190_v21, %v3185_v35  ;;  %v230_v21 = vadd.s32 4294967256, %v3315_v37 }
 0x320   :  { %v223_v35 = vadd.s32 4294967264, %v3315_v37 }
 0x321   :  { %v2327_v20 = vrot.slane %v2319_v0, %v3415_v43 }
 0x323   :  { %v2335_v19 = vrot.slane %v2327_v20, %v3415_v43  ;;  %v2328_v22 = vcombine.high %v2327_v20, %v2327_v20 }
 0x325   :  { %v2346_v34 = vrot.slane %v2335_v19, %v2977_v12  ;;  %v2342_v45 = vrot.slane %v2328_v22, %v3415_v43 }
 0x327   :  { %v2353_v46 = vsub.f32 %v2346_v34, %v3423_v60  ;;  %v2350_v63 = vrot.slane %v2342_v45, %v2977_v12 }
 0x329   :  { %v2355_v38 = vmul.f32 %v2353_v46, %v2353_v46  ;;  %v2354_v17 = vsub.f32 %v2350_v63, %v3423_v60 }
 0x32b   :  { %v2357_v14 = vsel %vm1402_vm5, %v2355_v38, 0.0  ;;  %v2356_v48 = vmul.f32 %v2354_v17, %v2354_v17 }
 0x32c   :  { %2358 = vadd.xlane.f32.xlu0 %v2357_v14 }
 0x32d   :  { %v2360_v30 = vsel %vm1402_vm5, %v2356_v48, 0.0 }
 0x330   :  { %2361 = vadd.xlane.f32.xlu0 %v2360_v30 }
 0x379   :  { %v1405_v33 = vpop.xlane.xlu0 %1404 }
 0x37a   :  { %v1414_v55 = vrot.slane %v1405_v33, %v3334_v9 }
 0x37b   :  { %v1408_v28 = vpop.xlane.xlu1 %1407 }
 0x37c   :  { %v1418_v50 = vrot.slane %v1408_v28, %v3334_v9 }
 0x37e   :  { %v1419_v42 = vsel %vm290_vm4, %v1418_v50, %v1414_v55  ;;  %v237_v50 = vadd.s32 4294967248, %v3315_v37 }
 0x37f   :  { %v1422_v51 = vsel %vm1421_vm6, %v1419_v42, inf  ;;  %v201_v42 = vrot.slane %v3076_v53, %v3334_v9  ;;  %v3561_v53 = vsub.s32 %v223_v35, %v2969_v6 }
 0x380   :  { %1423 = vmin.xlane.f32.xlu1 %v1422_v51  ;;  %v206_v51 = vrot.slane %v3074_v52, %v3325_v39  ;;  %v3564_v52 = vsub.s32 %v237_v50, %v2969_v6 }
 0x391   :  { %1439 = vbcast.lane.b32.xlu1 %v3315_v37, 256 }
 0x3b9   :  { %v2359_v31 = vpop.xlane.xlu0 %2358 }
 0x3ba   :  { %v2368_v26 = vrot.slane %v2359_v31, %v3334_v9 }
 0x3bd   :  { %v2362_v61 = vpop.xlane.xlu0 %2361 }
 0x3be   :  { %v2372_v18 = vrot.slane %v2362_v61, %v3334_v9 }
 0x3c0   :  { %v2373_v1 = vsel %vm290_vm4, %v2372_v18, %v2368_v26  ;;  %v220_v26 = vrot.slane %v3084_v56, %v3337_v44  ;;  %v3556_v18 = vsub.s32 %v230_v21, %v2969_v6  ;;  %v268_v56 = vrot.slane %v3100_v2, %v3337_v44  ;;  %v4133_v21 = vld [vmem:[#allocation12_spill] sm:$0xff] }
 0x3c1   :  { %v2375_v15 = vsel %vm1421_vm6, %v2373_v1, inf  ;;  %v254_v1 = vrot.slane %v3086_v57, %v3334_v9  ;;  %v263_v57 = vrot.slane %v3090_v59, %v3330_v32  ;;  %v227_v2 = vrot.slane %v3078_v8, %v3561_v53  ;;  %v4126_v8 = vld [vmem:[#allocation9_spill] sm:$0xff] }
 0x3c2   :  { %2376 = vmin.xlane.f32.xlu0 %v2375_v15  ;;  %v244_v15 = vadd.s32 4294967240, %v3315_v37  ;;  %v429_v59 = vrot.slane %v3102_v3, %v3334_v9  ;;  %v4127_v3 = vld [vmem:[#allocation15_spill] sm:$0xff] }
 0x40d   :  { %v1424_v29 = vpop.xlane.xlu1 %1423 }
 0x40e   :  { %v1429_v40 = vrot.slane %v1424_v29, %v2977_v12  ;;  %v1433_v47 = vrot.slane %v1424_v29, %v2984_v16 }
 0x410   :  { %vm1436_vm7 = vcmp.le.f32.partialorder %v1405_v33, %v1429_v40  ;;  %vm1437_vm8 = vcmp.le.f32.partialorder %v1408_v28, %v1433_v47  ;;  %v433_v40 = vrot.slane %v3112_v10, %v3325_v39  ;;  %v3587_v10 = vsub.s32 %v244_v15, %v2969_v6 }
 0x411   :  { %v1440_v27 = vpop.permute.xlu1 %1439 }
 0x412   :  { %v1442_v5 = vsel %vm1437_vm8, %v1440_v27, 4  ;;  %v1441_v36 = vsel %vm1436_vm7, %v1440_v27, 4  ;;  %v288_v35 = vrot.slane %v4133_v21, %v3587_v10 }
 0x413   :  { %1447 = vperm.xlu1 %2806, %v1442_v5   ;;  %1444 = vperm.xlu0 %2807, %v1441_v36   ;;  %v472_v5 = vrot.slane %v3128_v23, %v3325_v39 }
 0x44f   :  { %v2377_v13 = vpop.xlane.xlu0 %2376 }
 0x450   :  { %v2382_v49 = vrot.slane %v2377_v13, %v2977_v12  ;;  %v2386_v41 = vrot.slane %v2377_v13, %v2984_v16 }
 0x452   :  { %vm2389_vm9 = vcmp.le.f32.partialorder %v2359_v31, %v2382_v49  ;;  %vm2390_vm10 = vcmp.le.f32.partialorder %v2362_v61, %v2386_v41  ;;  %v258_v31 = vrot.slane %v3096_v62, %v3325_v39  ;;  %v213_v61 = vrot.slane %v3080_v54, %v3330_v32  ;;  %v4125_v49 = vld [vmem:[#allocation16_spill] sm:$0xff] }
 0x453   :  { %v2392_v24 = vsel %vm2390_vm10, %v1440_v27, 4  ;;  %v2391_v7 = vsel %vm2389_vm9, %v1440_v27, 4  ;;  %v208_v62 = vsel %vm207_vm1, %v206_v51, %v201_v42  ;;  %v234_v27 = vrot.slane %v3088_v58, %v3556_v18  ;;  %v4134_v51 = vld [vmem:[#allocation10_spill] sm:$0xff] }
 0x454   :  { %2397 = vperm.xlu0 %2807, %v2392_v24   ;;  %2394 = vperm.xlu1 %2806, %v2391_v7   ;;  %v259_v54 = vsel %vm207_vm1, %v258_v31, %v254_v1  ;;  %v215_v29 = vsel %vm214_vm2, %v213_v61, %v208_v62  ;;  %v278_v58 = vrot.slane %v3104_v4, %v3556_v18  ;;  %v4135_v1 = vld [vmem:[#allocation17_spill] sm:$0xff] }
 0x455   :  { %v222_v47 = vsel %vm221_vm3, %v220_v26, %v215_v29  ;;  %v264_v36 = vsel %vm214_vm2, %v263_v57, %v259_v54  ;;  %v468_v23 = vrot.slane %v4125_v49, %v3334_v9  ;;  %v273_v24 = vrot.slane %v4126_v8, %v3561_v53  ;;  %v4136_v54 = vld [vmem:[#allocation24_spill] sm:$0xff]  ;;  %v4141_v49 = vld [vmem:[#allocation31_spill] sm:$0xff] }
 0x456   :  { %v269_v13 = vsel %vm221_vm3, %v268_v56, %v264_v36  ;;  %v229_v41 = vsel %vm228_vm11, %v227_v2, %v222_v47  ;;  %v434_v7 = vsel %vm207_vm1, %v433_v40, %v429_v59  ;;  %v283_v31 = vrot.slane %v4134_v51, %v3564_v52  ;;  %v4137_v29 = vld [vmem:[#allocation36_spill] sm:$0xff]  ;;  %v4138_v47 = vld [vmem:[#allocation13_spill] sm:$0xff] }
 0x457   :  { %v473_v4 = vsel %vm207_vm1, %v472_v5, %v468_v23  ;;  %v453_v62 = vrot.slane %v4135_v1, %v3556_v18  ;;  %v492_v56 = vrot.slane %v4136_v54, %v3556_v18  ;;  %v685_v57 = vrot.slane %v4137_v29, %v3325_v39  ;;  %v4139_v5 = vld [vmem:[#allocation20_spill] sm:$0xff] }
 0x458   :  { %847 = vperm.xlu1 %2806, %v786_v11   ;;  %v443_v11 = vrot.slane %v4127_v3, %v3337_v44  ;;  %v487_v2 = vrot.slane %v4139_v5, %v3561_v53  ;;  %v4140_v36 = vld [vmem:[#allocation28_spill] sm:$0xff]  ;;  %v681_v23 = vrot.slane %v4141_v49, %v3334_v9  ;;  %v4143_v3 = vld [vmem:[#allocation23_spill] sm:$0xff]  ;;  %v4154_v5 = vld [vmem:[#allocation41_spill] sm:$0xff] }
 0x459   :  { %v646_v59 = vrot.slane %v4140_v36, %v3325_v39  ;;  %v4151_v1 = vld [vmem:[#allocation44_spill] sm:$0xff]  ;;  %v4156_v49 = vld [vmem:[#allocation27_spill] sm:$0xff] }
 0x45a   :  { %v4155_v36 = vld [vmem:[#allocation52_spill] sm:$0xff] }
 0x492   :  { %v1448_v0 = vpop.permute.xlu1 %1447  ;;  %v1445_v20 = vpop.permute.xlu0 %1444 }
 0x493   :  { %v1456_v19 = vrot.slane %v1448_v0, %v3334_v9  ;;  %v1452_v22 = vrot.slane %v1445_v20, %v3334_v9  ;;  %v236_v0 = vsel %vm235_vm12, %v234_v27, %v229_v41  ;;  %v4128_v20 = vld [vmem:[#allocation11_spill] sm:$0xff]  ;;  %v448_v27 = vrot.slane %v4138_v47, %v3561_v53  ;;  %v4142_v41 = vld [vmem:[#allocation14_spill] sm:$0xff] }
 0x494   :  { %v458_v8 = vrot.slane %v4142_v41, %v3564_v52  ;;  %v4153_v47 = vld [vmem:[#allocation35_spill] sm:$0xff] }
 0x495   :  { %v1457_v34 = vsel %vm290_vm4, %v1456_v19, %v1452_v22  ;;  %v438_v19 = vrot.slane %v4128_v20, %v3330_v32  ;;  %v4129_v22 = vld [vmem:[#allocation22_spill] sm:$0xff] }
 0x496   :  { %v3524_v45 = vsel %vm1421_vm6, %v1457_v34, 2147483647  ;;  %v482_v34 = vrot.slane %v4129_v22, %v3337_v44 }
 0x497   :  { %v1460_v46 = vshra.s32 %v3524_v45, 16  ;;  %v439_v50 = vsel %vm214_vm2, %v438_v19, %v434_v7  ;;  %v686_v19 = vsel %vm207_vm1, %v685_v57, %v681_v23  ;;  %v1459_v57 = vand.u32 65535, %v3524_v45  ;;  %v4157_v45 = vld [vmem:[#allocation32_spill] sm:$0xff] }
 0x498   :  { %v444_v61 = vsel %vm221_vm3, %v443_v11, %v439_v50  ;;  %v642_v11 = vrot.slane %v4143_v3, %v3334_v9  ;;  %v661_v23 = vrot.slane %v4156_v49, %v3561_v53  ;;  %v666_v41 = vrot.slane %v4157_v45, %v3556_v18 }
 0x499   :  { %v3527_v63 = vcvt.s32.f32 %v1460_v46  ;;  %v4130_v46 = vld [vmem:[#allocation7_spill] sm:$0xff] }
 0x49b   :  { %1463 = vmin.xlane.f32.xlu0 %v3527_v63 }
 0x4b1   :  { %850 = vperm.xlu0 %2807, %v787_v25   ;;  %v241_v25 = vrot.slane %v4130_v46, %v3564_v52 }
 0x4b3   :  { %v243_v42 = vsel %vm242_vm13, %v241_v25, %v236_v0  ;;  %v647_v25 = vsel %vm207_vm1, %v646_v59, %v642_v11  ;;  %v898_v59 = vrot.slane %v4155_v36, %v3325_v39  ;;  %v4159_v11 = vld [vmem:[#allocation47_spill] sm:$0xff] }
 0x4d3   :  { %v2395_v38 = vpop.permute.xlu1 %2394  ;;  %v2398_v17 = vpop.permute.xlu0 %2397 }
 0x4d4   :  { %v2402_v14 = vrot.slane %v2395_v38, %v3334_v9  ;;  %v2406_v48 = vrot.slane %v2398_v17, %v3334_v9  ;;  %v274_v38 = vsel %vm228_vm11, %v273_v24, %v269_v13  ;;  %v4131_v17 = vld [vmem:[#allocation18_spill] sm:$0xff]  ;;  %v449_v24 = vsel %vm228_vm11, %v448_v27, %v444_v61 }
 0x4d5   :  { %v454_v0 = vsel %vm235_vm12, %v453_v62, %v449_v24  ;;  %v859_v62 = vrot.slane %v4151_v1, %v3325_v39  ;;  %v700_v27 = vrot.slane %v4153_v47, %v3561_v53  ;;  %v894_v39 = vrot.slane %v4159_v11, %v3334_v9  ;;  %v2773_v1 = vld [vmem:[%s4057_s2] ss:$0 sm:$0xff] }
 0x4d6   :  { %v2407_v30 = vsel %vm290_vm4, %v2406_v48, %v2402_v14  ;;  %v477_v14 = vrot.slane %v4131_v17, %v3330_v32  ;;  %v4132_v48 = vld [vmem:[#allocation8_spill] sm:$0xff] }
 0x4d7   :  { %v3536_v33 = vsel %vm1421_vm6, %v2407_v30, 2147483647  ;;  %v248_v30 = vrot.slane %v4132_v48, %v3587_v10  ;;  %vm1519_vm6 = vcmask 254976  }
 0x4d8   :  { %v2410_v28 = vshra.s32 %v3536_v33, 16  ;;  %v478_v26 = vsel %vm214_vm2, %v477_v14, %v473_v4  ;;  %v4144_v4 = vld [vmem:[#allocation38_spill] sm:$0xff]  ;;  %v4147_v14 = vld [vmem:[#allocation33_spill] sm:$0xff] }
 0x4d9   :  { %v483_v15 = vsel %vm221_vm3, %v482_v34, %v478_v26  ;;  %v250_v13 = vsel %vm249_vm14, %v248_v30, %v243_v42  ;;  %v695_v22 = vrot.slane %v4144_v4, %v3337_v44  ;;  %v4145_v34 = vld [vmem:[#allocation21_spill] sm:$0xff]  ;;  %v690_v48 = vrot.slane %v4147_v14, %v3330_v32 }
 0x4da   :  { %v3539_v55 = vcvt.s32.f32 %v2410_v28  ;;  %v279_v28 = vsel %vm235_vm12, %v278_v58, %v274_v38  ;;  %v488_v7 = vsel %vm228_vm11, %v487_v2, %v483_v15  ;;  %v497_v46 = vrot.slane %v4145_v34, %v3564_v52  ;;  %v4146_v38 = vld [vmem:[#allocation30_spill] sm:$0xff]  ;;  %v4150_v42 = vld [vmem:[#allocation25_spill] sm:$0xff] }
 0x4db   :  { %v284_v40 = vsel %vm242_vm13, %v283_v31, %v279_v28  ;;  %v493_v20 = vsel %vm235_vm12, %v492_v56, %v488_v7  ;;  %v656_v17 = vrot.slane %v4146_v38, %v3337_v44  ;;  %v4148_v28 = vld [vmem:[#allocation19_spill] sm:$0xff]  ;;  %v651_v51 = vrot.slane %v4150_v42, %v3330_v32  ;;  %v4158_v7 = vld [vmem:[#allocation46_spill] sm:$0xff] }
 0x4dc   :  { %2413 = vmin.xlane.f32.xlu1 %v3539_v55  ;;  %v289_v58 = vsel %vm249_vm14, %v288_v35, %v284_v40  ;;  %v463_v21 = vrot.slane %v4148_v28, %v3587_v10  ;;  %v4149_v35 = vld [vmem:[#allocation26_spill] sm:$0xff]  ;;  %v459_v31 = vsel %vm242_vm13, %v458_v8, %v454_v0  ;;  %v498_v61 = vsel %vm242_vm13, %v497_v46, %v493_v20  ;;  %v4152_v56 = vld [vmem:[#allocation39_spill] sm:$0xff]  ;;  %v4161_v46 = vld [vmem:[#allocation40_spill] sm:$0xff] }
 0x4dd   :  { %v291_v30 = vsel %vm290_vm4, %v289_v58, %v250_v13  ;;  %v502_v50 = vrot.slane %v4149_v35, %v3587_v10  ;;  %v691_v26 = vsel %vm214_vm2, %v690_v48, %v686_v19  ;;  %v652_v15 = vsel %vm214_vm2, %v651_v51, %v647_v25  ;;  %v4160_v19 = vld [vmem:[#allocation42_spill] sm:$0xff] }
 0x4de   :  { %v696_v54 = vsel %vm221_vm3, %v695_v22, %v691_v26  ;;  %v705_v29 = vrot.slane %v4152_v56, %v3556_v18  ;;  %v657_v40 = vsel %vm221_vm3, %v656_v17, %v652_v15  ;;  %v855_v2 = vrot.slane %v4154_v5, %v3334_v9  ;;  %v4162_v17 = vld [vmem:[#allocation53_spill] sm:$0xff]  ;;  %v4165_v51 = vld [vmem:[#allocation34_spill] sm:$0xff] }
 0x4df   :  { %v464_v13 = vsel %vm249_vm14, %v463_v21, %v459_v31  ;;  %v503_v58 = vsel %vm249_vm14, %v502_v50, %v498_v61  ;;  %v701_v8 = vsel %vm228_vm11, %v700_v27, %v696_v54  ;;  %v869_v3 = vrot.slane %v4158_v7, %v3337_v44  ;;  %v4163_v9 = vld [vmem:[#allocation37_spill] sm:$0xff]  ;;  %v4168_v54 = vld [vmem:[#allocation43_spill] sm:$0xff]  ;;  %v4169_v27 = vld [vmem:[#allocation54_spill] sm:$0xff] }
 0x4e0   :  { %v860_v24 = vsel %vm207_vm1, %v859_v62, %v855_v2  ;;  %v662_v0 = vsel %vm228_vm11, %v661_v23, %v657_v40  ;;  %v706_v20 = vsel %vm235_vm12, %v705_v29, %v701_v8  ;;  %v864_v4 = vrot.slane %v4160_v19, %v3330_v32  ;;  %v4164_v21 = vld [vmem:[#allocation49_spill] sm:$0xff] }
 0x4e1   :  { %v1461_v34 = vcvt.s32.f32 %v1459_v57  ;;  %v715_v25 = vrot.slane %v4161_v46, %v3587_v10  ;;  %v899_v38 = vsel %vm207_vm1, %v898_v59, %v894_v39  ;;  %v908_v14 = vrot.slane %v4162_v17, %v3337_v44  ;;  %v4166_v44 = vld [vmem:[#allocation48_spill] sm:$0xff]  ;;  %v4167_v62 = vld [vmem:[#allocation29_spill] sm:$0xff]  ;;  %v4170_v59 = vld [vmem:[#allocation51_spill] sm:$0xff] }
 0x4e2   :  { %v710_v48 = vrot.slane %v4163_v9, %v3564_v52  ;;  %v865_v28 = vsel %vm214_vm2, %v864_v4, %v860_v24  ;;  %v903_v35 = vrot.slane %v4164_v21, %v3330_v32  ;;  %v667_v42 = vsel %vm235_vm12, %v666_v41, %v662_v0  ;;  %v2788_v17 = vld [vmem:[%s4062_s7 + $0x4] sm:$0xf]  ;;  %v2790_v9 = vld [vmem:[%s4062_s7 + $0x8] sm:$0xf] }
 0x4e3   :  { %v676_v31 = vrot.slane %v4165_v51, %v3587_v10  ;;  %v870_v61 = vsel %vm221_vm3, %v869_v3, %v865_v28  ;;  %v879_v26 = vrot.slane %v4166_v44, %v3556_v18  ;;  %v671_v32 = vrot.slane %v4167_v62, %v3564_v52 }
 0x4e4   :  { %v711_v15 = vsel %vm242_vm13, %v710_v48, %v706_v20  ;;  %v874_v56 = vrot.slane %v4168_v54, %v3561_v53  ;;  %v904_v29 = vsel %vm214_vm2, %v903_v35, %v899_v38  ;;  %v504_v57 = vsel %vm290_vm4, %v503_v58, %v464_v13  ;;  %v4171_v58 = vld [vmem:[#allocation50_spill] sm:$0xff] }
 0x4e5   :  { %v716_v40 = vsel %vm249_vm14, %v715_v25, %v711_v15  ;;  %v909_v47 = vsel %vm221_vm3, %v908_v14, %v904_v29  ;;  %v918_v5 = vrot.slane %v4169_v27, %v3556_v18  ;;  %v672_v2 = vsel %vm242_vm13, %v671_v32, %v667_v42  ;;  %v4172_v18 = vld [vmem:[#allocation45_spill] sm:$0xff]  ;;  %v2781_v38 = vld [vmem:[%s4062_s7 + $0xc] sm:$0xf] }
 0x4e6   :  { %v875_v36 = vsel %vm228_vm11, %v874_v56, %v870_v61  ;;  %v913_v49 = vrot.slane %v4170_v59, %v3561_v53  ;;  %v293_v45 = vadd.f32 %v2773_v1, %v291_v30  ;;  %v677_v41 = vsel %vm249_vm14, %v676_v31, %v672_v2  ;;  %v2779_v25 = vld [vmem:[%s4062_s7 + $0x8] sm:$0xf]  ;;  %v2792_v48 = vld [vmem:[%s4062_s7 + $0xc] sm:$0xf] }
 0x4e7   :  { %v880_v13 = vsel %vm235_vm12, %v879_v26, %v875_v36  ;;  %v889_v8 = vrot.slane %v4171_v58, %v3587_v10  ;;  %v717_v24 = vsel %vm290_vm4, %v716_v40, %v677_v41  ;;  %v884_v7 = vrot.slane %v4172_v18, %v3564_v52 }
 0x4e8   :  { %v914_v3 = vsel %vm228_vm11, %v913_v49, %v909_v47  ;;  %v506_v39 = vadd.f32 %v504_v57, %v293_v45  ;;  %v2894_v14 = vmov 1   ;;  %v2409_v28 = vand.u32 65535, %v3536_v33 }
 0x4e9   :  { %v919_v53 = vsel %vm235_vm12, %v918_v5, %v914_v3  ;;  %v885_v0 = vsel %vm242_vm13, %v884_v7, %v880_v13  ;;  %2813 = vset.pattern.permute.xlu0 %v2894_v14  ;;  %vm1473_vm2 = vcmask 1024   ;;  %v2895_v26 = vmov 0.0  }
 0x4ea   :  { %v719_v19 = vadd.f32 %v717_v24, %v506_v39  ;;  %v890_v4 = vsel %vm249_vm14, %v889_v8, %v885_v0  ;;  %v2411_v35 = vcvt.s32.f32 %v2409_v28  ;;  %v2897_v32 = vmov 3  }
 0x4eb   :  { %v4173_v15 = vmov 0  }
 0x528   :  { %v3698_v22 = vpop.xlane.xlu0 %1463 }
 0x529   :  { %vm1465_vm15 = vcmp.eq.f32.partialorder %v3527_v63, %v3698_v22  ;;  %v848_v63 = vpop.permute.xlu1 %847  ;;  %v1470_v42 = vcvt.f32.s32 %v3698_v22  ;;  %v2896_v22 = vmov 2  }
 0x52a   :  { %v1466_v50 = vsel %vm1465_vm15, %v1461_v34, inf  ;;  %v923_v23 = vrot.slane %v848_v63, %v3564_v52 }
 0x52b   :  { %1467 = vmin.xlane.f32.xlu1 %v1466_v50  ;;  %v1471_v31 = vshll.u32 %v1470_v42, 16 }
 0x52c   :  { %v924_v20 = vsel %vm242_vm13, %v923_v23, %v919_v53 }
 0x530   :  { %v851_v11 = vpop.permute.xlu0 %850 }
 0x531   :  { %v928_v30 = vrot.slane %v851_v11, %v3587_v10  ;;  %v2777_v10 = vld [vmem:[%s4062_s7 + $0x4] sm:$0xf] }
 0x533   :  { %v929_v34 = vsel %vm249_vm14, %v928_v30, %v924_v20 }
 0x534   :  { %v930_v52 = vsel %vm290_vm4, %v929_v34, %v890_v4  ;;  %vm2423_vm4 = vcmask 9224  }
 0x535   :  { %v932_v46 = vadd.f32 %v930_v52, %v719_v19 }
 0x537   :  { %934 = vst.msk [vmem:[%s4063_s8] sm:$0x3] %vm933_vm0, %v932_v46 }
 0x53c   :  { %1588 = vrot.lane.b32.xlu1 %v2777_v10, %s2891_s15  ;;  %v3853_v10 = vld [vmem:[%s4061_s6 + $0x4] sm:$0xf] }
 0x540   :  { %1620 = vrot.lane.b32.xlu1 %v2779_v25, %s2892_s18  ;;  %v3858_v25 = vld [vmem:[%s4061_s6] sm:$0xf] }
 0x544   :  { %1652 = vrot.lane.b32.xlu1 %v2781_v38, %s2893_s21 }
 0x548   :  { %2520 = vrot.lane.b32.xlu1 %v2788_v17, %s2891_s15 }
 0x54c   :  { %2550 = vrot.lane.b32.xlu1 %v2790_v9, %s2892_s18  ;;  %v3863_v9 = vrot.slane %v3423_v60, %v2984_v16 }
 0x550   :  { %2580 = vrot.lane.b32.xlu1 %v2792_v48, %s2893_s21  ;;  %v3867_v48 = vrot.slane %v3423_v60, %v2977_v12 }
 0x569   :  { %v2414_v21 = vpop.xlane.xlu1 %2413 }
 0x56a   :  { %vm2415_vm1 = vcmp.eq.f32.partialorder %v3539_v55, %v2414_v21  ;;  %v2420_v54 = vcvt.f32.s32 %v2414_v21 }
 0x56b   :  { %v2416_v50 = vsel %vm2415_vm1, %v2411_v35, inf }
 0x56c   :  { %2417 = vmin.xlane.f32.xlu0 %v2416_v50  ;;  %v2421_v29 = vshll.u32 %v2420_v54, 16 }
 0x5b8   :  { %v1468_v51 = vpop.xlane.xlu1 %1467 }
 0x5b9   :  { %v1469_v61 = vcvt.f32.s32 %v1468_v51 }
 0x5bb   :  { %v1472_v44 = vadd.s32 %v1471_v31, %v1469_v61  ;;  %v2778_v31 = vld [vmem:[%s4061_s6 + $0x8] sm:$0xf] }
 0x5bc   :  { %v1589_v36 = vpop.permute.xlu1 %1588  ;;  %v4174_v61 = vld [vmem:[#allocation5_spill] sm:$0xff] }
 0x5bd   :  { %vm1475_vm3 = vcmp.eq.s32.totalorder %v3315_v37, %v1472_v44  ;;  %1474 = vst.msk [vmem:[#allocation2] sm:$0x3] %vm1473_vm2, %v1472_v44  ;;  %v3876_v44 = vrot.slane %v3423_v60, %v4174_v61 }
 0x5be   :  { %v2775_v63 = vsel %vm1475_vm3, 1.0, %v2895_v26 }
 0x5bf   :  { %v1527_v33 = vrot.slane %v2775_v63, %v3415_v43 }
 0x5c0   :  { %v1621_v45 = vpop.permute.xlu1 %1620 }
 0x5c1   :  { %v1535_v1 = vrot.slane %v1527_v33, %v3415_v43  ;;  %v1528_v5 = vcombine.high %v1527_v33, %v1527_v33 }
 0x5c3   :  { %v3781_v55 = vrot.slane %v1535_v1, %v2977_v12  ;;  %v1542_v49 = vrot.slane %v1528_v5, %v3415_v43 }
 0x5c4   :  { %v1653_v58 = vpop.permute.xlu1 %1652 }
 0x5c5   :  { %v2814_v62 = vpack.i.bf16 %v3781_v55, %v2775_v63  ;;  %v1591_v24 = vmul.f32 %v1589_v36, %v3781_v55  ;;  %v1655_v53 = vmul.f32 %v1653_v58, %v3781_v55 }
 0x5c7   :  { %2815 = vperm.xlu0 %2813, %v2814_v62   ;;  %2809 = vperm.xlu1 %2806, %v2814_v62  }
 0x5c8   :  { %v2521_v8 = vpop.permute.xlu1 %2520 }
 0x5cb   :  { %2819 = vset.pattern.permute.xlu1 %v2896_v22  ;;  %2833 = vset.pattern.permute.xlu0 %v2896_v22 }
 0x5cc   :  { %2821 = vperm.xlu1 %2819, %v2814_v62   ;;  %v2551_v18 = vpop.permute.xlu1 %2550 }
 0x5d0   :  { %2825 = vset.pattern.permute.xlu1 %v2897_v32  ;;  %v2581_v11 = vpop.permute.xlu1 %2580 }
 0x5d1   :  { %2827 = vperm.xlu1 %2825, %v2814_v62  }
 0x5d5   :  { %2831 = vset.pattern.permute.xlu1 %v4173_v15 }
 0x5f9   :  { %v2418_v56 = vpop.xlane.xlu0 %2417 }
 0x5fa   :  { %v2419_v57 = vcvt.f32.s32 %v2418_v56  ;;  %v4175_v56 = vld [vmem:[#allocation6_spill] sm:$0xff] }
 0x5fc   :  { %v2422_v40 = vadd.s32 %v2421_v29, %v2419_v57  ;;  %v3884_v29 = vrot.slane %v3423_v60, %v4175_v56 }
 0x5fe   :  { %vm2425_vm5 = vcmp.eq.s32.totalorder %v3315_v37, %v2422_v40  ;;  %2424 = vst.msk [vmem:[#allocation2] sm:$0x3] %vm2423_vm4, %v2422_v40  ;;  %v3801_v37 = vrot.slane %v1542_v49, %v2977_v12 }
 0x5ff   :  { %v3789_v47 = vsel %vm2425_vm5, 1.0, %v2895_v26 }
 0x600   :  { %v2461_v27 = vrot.slane %v3789_v47, %v3415_v43  ;;  %v1656_v7 = vmul.f32 %v1653_v58, %v3801_v37  ;;  %v1592_v30 = vmul.f32 %v1589_v36, %v3801_v37  ;;  %v1624_v0 = vmul.f32 %v1621_v45, %v3801_v37 }
 0x602   :  { %v2469_v2 = vrot.slane %v2461_v27, %v3415_v43  ;;  %v2462_v23 = vcombine.high %v2461_v27, %v2461_v27  ;;  %v2780_v27 = vld [vmem:[%s4061_s6 + $0xc] sm:$0xf] }
 0x604   :  { %v3795_v59 = vrot.slane %v2469_v2, %v2977_v12  ;;  %v2476_v41 = vrot.slane %v2462_v23, %v3415_v43  ;;  %v1623_v43 = vmul.f32 %v1621_v45, %v3781_v55 }
 0x606   :  { %2537 = vperm.xlu0 %2833, %v3795_v59   ;;  %2487 = vperm.xlu1 %2831, %v3795_v59   ;;  %v3809_v13 = vrot.slane %v2476_v41, %v2977_v12  ;;  %v2553_v3 = vmul.f32 %v2551_v18, %v3795_v59  ;;  %v2583_v39 = vmul.f32 %v2581_v11, %v3795_v59 }
 0x607   :  { %v2523_v20 = vmul.f32 %v2521_v8, %v3795_v59 }
 0x608   :  { %v2524_v19 = vmul.f32 %v2521_v8, %v3809_v13  ;;  %v2554_v4 = vmul.f32 %v2551_v18, %v3809_v13  ;;  %v2584_v34 = vmul.f32 %v2581_v11, %v3809_v13 }
 0x60a   :  { %2836 = vset.pattern.permute.xlu0 %v2894_v14  ;;  %2832 = vset.pattern.permute.xlu1 %v2894_v14 }
 0x60b   :  { %1578 = vperm.xlu0 %2836, %v3801_v37   ;;  %2507 = vperm.xlu1 %2832, %v3795_v59  }
 0x60f   :  { %2839 = vset.pattern.permute.xlu0 %v4173_v15  ;;  %2834 = vset.pattern.permute.xlu1 %v2897_v32 }
 0x610   :  { %2491 = vperm.xlu0 %2839, %v3809_v13   ;;  %2567 = vperm.xlu1 %2834, %v3795_v59  }
 0x614   :  { %1627 = vrot.lane.b32.xlu0 %v1623_v43, %s2898_s3  ;;  %2835 = vset.pattern.permute.xlu1 %v4173_v15 }
 0x615   :  { %2842 = vset.pattern.permute.xlu0 %v2897_v32  ;;  %1557 = vperm.xlu1 %2835, %v3801_v37  }
 0x618   :  { %2571 = vperm.xlu0 %2842, %v3809_v13  }
 0x619   :  { %1595 = vrot.lane.b32.xlu1 %v1591_v24, %s2899_s26 }
 0x61a   :  { %2837 = vset.pattern.permute.xlu1 %v2896_v22 }
 0x61c   :  { %1661 = vrot.lane.b32.xlu0 %v1656_v7, %s2900_s27 }
 0x61d   :  { %2844 = vset.pattern.permute.xlu0 %v2894_v14  ;;  %1610 = vperm.xlu1 %2837, %v3801_v37  }
 0x620   :  { %2557 = vrot.lane.b32.xlu0 %v2553_v3, %s2898_s3 }
 0x621   :  { %2838 = vset.pattern.permute.xlu1 %v2897_v32 }
 0x622   :  { %1642 = vperm.xlu1 %2838, %v3801_v37  }
 0x624   :  { %2587 = vrot.lane.b32.xlu0 %v2583_v39, %s2900_s27 }
 0x626   :  { %2840 = vset.pattern.permute.xlu1 %v2894_v14 }
 0x627   :  { %2511 = vperm.xlu1 %2840, %v3809_v13  }
 0x628   :  { %2436 = vperm.xlu0 %2844, %v3789_v47  }
 0x62b   :  { %2841 = vset.pattern.permute.xlu1 %v2896_v22 }
 0x62c   :  { %2845 = vset.pattern.permute.xlu0 %v4173_v15  ;;  %2541 = vperm.xlu1 %2841, %v3809_v13  }
 0x630   :  { %1659 = vrot.lane.b32.xlu1 %v1655_v53, %s2900_s27 }
 0x631   :  { %2843 = vset.pattern.permute.xlu1 %v4173_v15 }
 0x634   :  { %1597 = vrot.lane.b32.xlu1 %v1592_v30, %s2899_s26  ;;  %v1564_v30 = vld [vmem:[%s4062_s7] sm:$0xf] }
 0x638   :  { %1629 = vrot.lane.b32.xlu1 %v1624_v0, %s2898_s3 }
 0x63c   :  { %2527 = vrot.lane.b32.xlu1 %v2523_v20, %s2899_s26 }
 0x640   :  { %2529 = vrot.lane.b32.xlu1 %v2524_v19, %s2899_s26  ;;  %v1567_v19 = vmul.f32 %v1564_v30, %v3781_v55  ;;  %v2789_v55 = vld [vmem:[%s4061_s6 + $0x8] sm:$0xf] }
 0x644   :  { %2559 = vrot.lane.b32.xlu1 %v2554_v4, %s2898_s3 }
 0x646   :  { %v2810_v52 = vpop.permute.xlu1 %2809  ;;  %v2816_v46 = vpop.permute.xlu0 %2815 }
 0x647   :  { %v2812_v38 = vunpack.i.h.bf16 %v2810_v52  ;;  %v2818_v17 = vunpack.i.h.bf16 %v2816_v46  ;;  %v2811_v28 = vunpack.i.l.bf16 %v2810_v52  ;;  %v2817_v21 = vunpack.i.l.bf16 %v2816_v46  ;;  %v2477_v46 = vld [vmem:[%s4061_s6] sm:$0xf] }
 0x648   :  { %2589 = vrot.lane.b32.xlu1 %v2584_v34, %s2900_s27  ;;  %v2787_v34 = vld [vmem:[%s4061_s6 + $0x4] sm:$0xf] }
 0x649   :  { %v1581_v35 = vmul.f32 %v2818_v17, %v3853_v10  ;;  %v1560_v50 = vmul.f32 %v2812_v38, %v3858_v25  ;;  %v1497_v33 = vmul.f32 %v2817_v21, %v3863_v9  ;;  %v1487_v1 = vmul.f32 %v2811_v28, %v3867_v48 }
 0x64b   :  { %v2822_v42 = vpop.permute.xlu1 %2821  ;;  %v1583_v51 = vadd.f32 %v1581_v35, %v1560_v50  ;;  %v1498_v36 = vadd.f32 %v1497_v33, %v1487_v1 }
 0x64c   :  { %v2824_v26 = vunpack.i.h.bf16 %v2822_v42  ;;  %v2823_v63 = vunpack.i.l.bf16 %v2822_v42  ;;  %2430 = vperm.xlu1 %2843, %v3789_v47  }
 0x64e   :  { %v1613_v62 = vmul.f32 %v2824_v26, %v2778_v31  ;;  %v1507_v54 = vmul.f32 %v2823_v63, %v3876_v44 }
 0x650   :  { %v2828_v57 = vpop.permute.xlu1 %2827  ;;  %v1615_v40 = vadd.f32 %v1613_v62, %v1583_v51  ;;  %v1508_v23 = vadd.f32 %v1507_v54, %v1498_v36  ;;  %v2791_v51 = vld [vmem:[%s4061_s6 + $0xc] sm:$0xf]  ;;  %s2901_s6 = smov [#allocation2]  }
 0x651   :  { %v2830_v5 = vunpack.i.h.bf16 %v2828_v57  ;;  %v2829_v2 = vunpack.i.l.bf16 %v2828_v57 }
 0x653   :  { %v1645_v49 = vmul.f32 %v2830_v5, %v2780_v27  ;;  %v1517_v45 = vmul.f32 %v2829_v2, %v3884_v29 }
 0x655   :  { %v3890_v41 = vadd.f32 %v1645_v49, %v1615_v40  ;;  %v1518_v58 = vadd.f32 %v1517_v45, %v1508_v23  ;;  %v2498_v40 = vld [vmem:[%s4062_s7] sm:$0xf]  ;;  %s2757_s7 = sshll.u32 %s2901_s6, 4  ;;  %s2758_s7 = int_to_ptr.vmem [resolvable:$true] %s2757_s7 }
 0x656   :  { %v2501_v23 = vmul.f32 %v2498_v40, %v3795_v59  ;;  %s2865_s3 = scalar_lea.vmem %s2758_s7, 32  ;;  %p2870_p1 = scmp.lt.s32.totalorder %s2758_s7, %s2758_s7 }
 0x657   :  { %1520 = vst.msk [vmem:[%s4064_s9] sm:$0x3] %vm1519_vm6, %v1518_v58  ;;  %p2866_p0 = scmp.ne.s32.totalorder %s2758_s7, %s2865_s3  ;;  %p2871_p2 = scmp.lt.s32.totalorder %s2865_s3, %s2865_s3 }
 0x659   :  { %p2872_p3 = por %p2871_p2, %p2870_p1 }
 0x65b   :  { %p2873_p4 = pnand %p2872_p3, %p2866_p0 }
 0x685   :  { %v2488_v60 = vpop.permute.xlu1 %2487  ;;  %v2538_v18 = vpop.permute.xlu0 %2537 }
 0x686   :  { %v2494_v35 = vmul.f32 %v2488_v60, %v2477_v46  ;;  %v2544_v33 = vmul.f32 %v2789_v55, %v2538_v18 }
 0x68a   :  { %v2508_v43 = vpop.permute.xlu1 %2507  ;;  %v1579_v3 = vpop.permute.xlu0 %1578 }
 0x68b   :  { %v2514_v17 = vmul.f32 %v2787_v34, %v2508_v43  ;;  %v1582_v5 = vmul.f32 %v3853_v10, %v1579_v3 }
 0x68d   :  { %v2516_v42 = vadd.f32 %v2514_v17, %v2494_v35 }
 0x68f   :  { %v2568_v8 = vpop.permute.xlu1 %2567  ;;  %v2492_v39 = vpop.permute.xlu0 %2491  ;;  %v2546_v1 = vadd.f32 %v2544_v33, %v2516_v42 }
 0x690   :  { %v2574_v62 = vmul.f32 %v2791_v51, %v2568_v8  ;;  %v2495_v59 = vmul.f32 %v2492_v39, %v2477_v46 }
 0x692   :  { %v2576_v49 = vadd.f32 %v2574_v62, %v2546_v1 }
 0x693   :  { %v1628_v20 = vpop.permute.xlu0 %1627 }
 0x694   :  { %v1558_v24 = vpop.permute.xlu1 %1557 }
 0x695   :  { %v1561_v54 = vmul.f32 %v1558_v24, %v3858_v25  ;;  %v1568_v25 = vmul.f32 %v1564_v30, %v3801_v37 }
 0x697   :  { %v2572_v38 = vpop.permute.xlu0 %2571  ;;  %v1584_v45 = vadd.f32 %v1582_v5, %v1561_v54 }
 0x698   :  { %v1596_v7 = vpop.permute.xlu1 %1595 }
 0x699   :  { %v1601_v4 = vadd.f32 %v1596_v7, %v1567_v19 }
 0x69b   :  { %v1633_v28 = vadd.f32 %v1628_v20, %v1601_v4  ;;  %v1662_v26 = vpop.permute.xlu0 %1661 }
 0x69c   :  { %v1611_v11 = vpop.permute.xlu1 %1610 }
 0x69d   :  { %v1614_v2 = vmul.f32 %v2778_v31, %v1611_v11 }
 0x69f   :  { %v2558_v36 = vpop.permute.xlu0 %2557  ;;  %v1616_v8 = vadd.f32 %v1614_v2, %v1584_v45 }
 0x6a1   :  { %v1643_v53 = vpop.permute.xlu1 %1642 }
 0x6a2   :  { %v1646_v58 = vmul.f32 %v2780_v27, %v1643_v53  ;;  %v2502_v53 = vmul.f32 %v2498_v40, %v3809_v13 }
 0x6a3   :  { %v2588_v20 = vpop.permute.xlu0 %2587 }
 0x6a4   :  { %v1648_v7 = vadd.f32 %v1646_v58, %v1616_v8 }
 0x6a6   :  { %v2512_v0 = vpop.permute.xlu1 %2511 }
 0x6a7   :  { %v2515_v10 = vmul.f32 %v2787_v34, %v2512_v0  ;;  %v2575_v0 = vmul.f32 %v2791_v51, %v2572_v38 }
 0x6a9   :  { %v2517_v37 = vadd.f32 %v2515_v10, %v2495_v59 }
 0x6ab   :  { %v2542_v52 = vpop.permute.xlu1 %2541 }
 0x6ac   :  { %v2545_v27 = vmul.f32 %v2789_v55, %v2542_v52 }
 0x6ae   :  { %v2547_v17 = vadd.f32 %v2545_v27, %v2517_v37 }
 0x6af   :  { %v1660_v21 = vpop.permute.xlu1 %1659 }
 0x6b0   :  { %v1665_v50 = vadd.f32 %v1660_v21, %v1633_v28  ;;  %v2577_v35 = vadd.f32 %v2575_v0, %v2547_v17 }
 0x6b2   :  { %1669 = vperm.xlu0 %2845, %v1665_v50  }
 0x6b3   :  { %v1598_v63 = vpop.permute.xlu1 %1597 }
 0x6b4   :  { %v1602_v24 = vadd.f32 %v1598_v63, %v1568_v25 }
 0x6b6   :  { %2848 = vset.pattern.permute.xlu0 %v2897_v32 }
 0x6b7   :  { %v1630_v57 = vpop.permute.xlu1 %1629  ;;  %1838 = vperm.xlu0 %2848, %v3890_v41  }
 0x6b8   :  { %v1634_v3 = vadd.f32 %v1630_v57, %v1602_v24 }
 0x6ba   :  { %v1666_v19 = vadd.f32 %v1662_v26, %v1634_v3 }
 0x6bb   :  { %v2528_v60 = vpop.permute.xlu1 %2527  ;;  %2850 = vset.pattern.permute.xlu0 %v2894_v14 }
 0x6bc   :  { %v2533_v43 = vadd.f32 %v2528_v60, %v2501_v23  ;;  %2642 = vperm.xlu0 %2850, %v2576_v49  }
 0x6be   :  { %v2563_v18 = vadd.f32 %v2558_v36, %v2533_v43 }
 0x6bf   :  { %v2530_v31 = vpop.permute.xlu1 %2529 }
 0x6c0   :  { %v2593_v11 = vadd.f32 %v2588_v20, %v2563_v18  ;;  %2852 = vset.pattern.permute.xlu0 %v4173_v15  ;;  %v2534_v4 = vadd.f32 %v2530_v31, %v2502_v53 }
 0x6c1   :  { %1686 = vperm.xlu0 %2852, %v1648_v7  }
 0x6c2   :  { %2597 = vperm.xlu1 %2843, %v2593_v11  }
 0x6c3   :  { %v2560_v30 = vpop.permute.xlu1 %2559 }
 0x6c4   :  { %v2564_v28 = vadd.f32 %v2560_v30, %v2534_v4 }
 0x6c5   :  { %2853 = vset.pattern.permute.xlu0 %v2894_v14 }
 0x6c6   :  { %1674 = vperm.xlu1 %2843, %v1666_v19   ;;  %1738 = vperm.xlu0 %2853, %v1648_v7  }
 0x6c7   :  { %v2590_v34 = vpop.permute.xlu1 %2589 }
 0x6c8   :  { %v2594_v21 = vadd.f32 %v2590_v34, %v2564_v28 }
 0x6ca   :  { %2602 = vperm.xlu1 %2843, %v2594_v21   ;;  %2856 = vset.pattern.permute.xlu0 %v4173_v15 }
 0x6cb   :  { %2614 = vperm.xlu0 %2856, %v2577_v35  }
 0x6ce   :  { %1681 = vperm.xlu1 %2843, %v3890_v41  }
 0x6cf   :  { %2859 = vset.pattern.permute.xlu0 %v2896_v22 }
 0x6d0   :  { %2678 = vperm.xlu0 %2859, %v2577_v35  }
 0x6d2   :  { %2846 = vset.pattern.permute.xlu1 %v2894_v14 }
 0x6d3   :  { %1734 = vperm.xlu1 %2846, %v3890_v41  }
 0x6d4   :  { %2860 = vset.pattern.permute.xlu0 %v2897_v32 }
 0x6d5   :  { %2710 = vperm.xlu0 %2860, %v2577_v35  }
 0x6d7   :  { %2847 = vset.pattern.permute.xlu1 %v2896_v22 }
 0x6d8   :  { %1786 = vperm.xlu1 %2847, %v3890_v41  }
 0x6dc   :  { %2849 = vset.pattern.permute.xlu1 %v4173_v15 }
 0x6dd   :  { %2609 = vperm.xlu1 %2849, %v2576_v49  }
 0x6e1   :  { %2851 = vset.pattern.permute.xlu1 %v2896_v22 }
 0x6e2   :  { %2674 = vperm.xlu1 %2851, %v2576_v49  }
 0x6e6   :  { %1790 = vperm.xlu1 %2851, %v1648_v7  }
 0x6ea   :  { %2854 = vset.pattern.permute.xlu1 %v2897_v32 }
 0x6eb   :  { %1842 = vperm.xlu1 %2854, %v1648_v7  }
 0x6ef   :  { %2855 = vset.pattern.permute.xlu1 %v2896_v22 }
 0x6f0   :  { %2442 = vperm.xlu1 %2855, %v3789_v47  }
 0x6f4   :  { %2857 = vset.pattern.permute.xlu1 %v2894_v14 }
 0x6f5   :  { %2646 = vperm.xlu1 %2857, %v2577_v35  }
 0x6f9   :  { %2858 = vset.pattern.permute.xlu1 %v2897_v32 }
 0x6fa   :  { %2706 = vperm.xlu1 %2858, %v2576_v49  }
 0x6fe   :  { %2448 = vperm.xlu1 %2858, %v3789_v47  }
 0x6ff   :  { %2876 = shalt.err (!%p2873_p4)
}
 0x700   :  { %s2877_s28 = scalar_lea.hbm %s4065_s10, 32 }
 0x701   :  { %p2878_p5 = scmp.ne.s32.totalorder %s4065_s10, %s2877_s28  ;;  %p2881_p6 = scmp.lt.u32.totalorder %s2877_s28, %s4065_s10 }
 0x703   :  { %p2883_p7 = pnand %p2881_p6, %p2878_p5 }
 0x705   :  { %2886 = shalt.err (!%p2883_p7)
}
 0x706   :  { %2760 = dma.vmem_to_hbm [thread:$0]  %s2758_s7, 32, %s4065_s10, [#allocation3]   ;;  %v3953_v14 = vpop.permute.xlu1 %2430  ;;  %v3959_v15 = vpop.permute.xlu0 %2436  ;;  %v1695_v52 = vsub.s32 4, %v2969_v6  ;;  %v2863_v46 = vld [vmem:[%s4055_s0] sm:$0xff]  ;;  %v1747_v50 = vsub.s32 5, %v2969_v6  ;;  %v1799_v26 = vsub.s32 6, %v2969_v6 }
 0x707   :  { %v1692_v38 = vrot.slane %v2863_v46, %v2977_v12  ;;  %v1744_v42 = vrot.slane %v2863_v46, %v2984_v16  ;;  %v1796_v1 = vrot.slane %v2863_v46, %v4174_v61  ;;  %v1851_v2 = vsub.s32 7, %v2969_v6  ;;  %v2864_v43 = vld [vmem:[%s4055_s0 + $0x8] sm:$0xff] }
 0x708   :  { %v1696_v55 = vrot.slane %v2863_v46, %v1695_v52  ;;  %v1748_v33 = vrot.slane %v2863_v46, %v1747_v50  ;;  %v1800_v40 = vrot.slane %v2863_v46, %v1799_v26  ;;  %v1848_v45 = vrot.slane %v2863_v46, %v4175_v56 }
 0x709   :  { %v1712_v63 = vrot.slane %v1692_v38, %v2977_v12  ;;  %v1764_v57 = vrot.slane %v1744_v42, %v2984_v16  ;;  %v1816_v23 = vrot.slane %v1796_v1, %v4174_v61  ;;  %v1700_v8 = vrot.slane %v2864_v43, %v2977_v12 }
 0x70a   :  { %v1716_v54 = vrot.slane %v1696_v55, %v2977_v12  ;;  %v1768_v49 = vrot.slane %v1748_v33, %v2984_v16  ;;  %v1820_v25 = vrot.slane %v1800_v40, %v4174_v61  ;;  %v1704_v24 = vrot.slane %v2864_v43, %v1695_v52 }
 0x70b   :  { %v1852_v18 = vrot.slane %v2863_v46, %v1851_v2  ;;  %v1868_v3 = vrot.slane %v1848_v45, %v4175_v56  ;;  %v1752_v11 = vrot.slane %v2864_v43, %v2984_v16  ;;  %v1756_v59 = vrot.slane %v2864_v43, %v1747_v50 }
 0x70c   :  { %v1804_v27 = vrot.slane %v2864_v43, %v4174_v61  ;;  %v1808_v19 = vrot.slane %v2864_v43, %v1799_v26  ;;  %v1720_v4 = vrot.slane %v1700_v8, %v2977_v12  ;;  %v1724_v17 = vrot.slane %v1704_v24, %v2977_v12 }
 0x70d   :  { %v1872_v28 = vrot.slane %v1852_v18, %v4175_v56  ;;  %v1772_v21 = vrot.slane %v1752_v11, %v2984_v16  ;;  %v1776_v35 = vrot.slane %v1756_v59, %v2984_v16  ;;  %v1860_v26 = vrot.slane %v2864_v43, %v1851_v2 }
 0x70e   :  { %v1824_v38 = vrot.slane %v1804_v27, %v4174_v61  ;;  %v1828_v50 = vrot.slane %v1808_v19, %v4174_v61 }
 0x731   :  { %v1670_v13 = vpop.permute.xlu0 %1669 }
 0x736   :  { %v1839_v39 = vpop.permute.xlu0 %1838 }
 0x737   :  { %v1881_v52 = vmul.f32 %v1868_v3, %v1839_v39 }
 0x73b   :  { %v3973_v62 = vpop.permute.xlu0 %2642 }
 0x740   :  { %v1687_v6 = vpop.permute.xlu0 %1686 }
 0x741   :  { %v3955_v22 = vpop.permute.xlu1 %2597  ;;  %v1727_v55 = vmul.f32 %v1720_v4, %v1687_v6  ;;  %v1728_v42 = vmul.f32 %v1724_v17, %v1687_v6  ;;  %v2439_v17 = vmul.f32 %v3959_v15, %v3863_v9 }
 0x745   :  { %v3957_v32 = vpop.permute.xlu1 %1674  ;;  %v1739_v46 = vpop.permute.xlu0 %1738 }
 0x746   :  { %v1731_v1 = vadd.f32 %v1727_v55, %v3957_v32  ;;  %v1780_v40 = vmul.f32 %v1776_v35, %v1739_v46 }
 0x749   :  { %v3961_v47 = vpop.permute.xlu1 %2602 }
 0x74a   :  { %v2615_v6 = vpop.permute.xlu0 %2614 }
 0x74d   :  { %v1682_v41 = vpop.permute.xlu1 %1681 }
 0x74e   :  { %v1725_v36 = vmul.f32 %v1712_v63, %v1682_v41  ;;  %v1726_v58 = vmul.f32 %v1716_v54, %v1682_v41  ;;  %v1882_v63 = vmul.f32 %v1872_v28, %v1839_v39  ;;  %v1732_v54 = vadd.f32 %v1728_v42, %v3957_v32 }
 0x74f   :  { %v2679_v28 = vpop.permute.xlu0 %2678 }
 0x750   :  { %v1729_v7 = vadd.f32 %v1725_v36, %v1670_v13  ;;  %v1730_v53 = vadd.f32 %v1726_v58, %v1670_v13  ;;  %v1880_v58 = vrot.slane %v1860_v26, %v4175_v56 }
 0x752   :  { %v1735_v51 = vpop.permute.xlu1 %1734 }
 0x753   :  { %v1777_v60 = vmul.f32 %v1764_v57, %v1735_v51  ;;  %v1778_v20 = vmul.f32 %v1768_v49, %v1735_v51  ;;  %v1856_v51 = vrot.slane %v2864_v43, %v4175_v56  ;;  %v1779_v57 = vmul.f32 %v1772_v21, %v1739_v46 }
 0x755   :  { %v1781_v37 = vadd.f32 %v1777_v60, %v1729_v7  ;;  %v1782_v0 = vadd.f32 %v1778_v20, %v1730_v53  ;;  %v1876_v45 = vrot.slane %v1856_v51, %v4175_v56  ;;  %v1783_v2 = vadd.f32 %v1779_v57, %v1731_v1 }
 0x756   :  { %v1784_v60 = vadd.f32 %v1780_v40, %v1732_v54  ;;  %v2711_v40 = vpop.permute.xlu0 %2710 }
 0x757   :  { %v1787_v5 = vpop.permute.xlu1 %1786 }
 0x758   :  { %v1829_v10 = vmul.f32 %v1816_v23, %v1787_v5  ;;  %v1830_v30 = vmul.f32 %v1820_v25, %v1787_v5 }
 0x75a   :  { %v1833_v34 = vadd.f32 %v1829_v10, %v1781_v37  ;;  %v1834_v13 = vadd.f32 %v1830_v30, %v1782_v0 }
 0x75c   :  { %v2610_v31 = vpop.permute.xlu1 %2609  ;;  %v3999_v33 = vadd.f32 %v1881_v52, %v1833_v34  ;;  %v4003_v36 = vadd.f32 %v1882_v63, %v1834_v13 }
 0x75e   :  { %v2620_v39 = vrot.slane %v3999_v33, %v2977_v12  ;;  %v2624_v25 = vrot.slane %v4003_v36, %v2977_v12  ;;  %v2652_v11 = vrot.slane %v3999_v33, %v2984_v16  ;;  %v2656_v30 = vrot.slane %v4003_v36, %v2984_v16 }
 0x75f   :  { %v2684_v34 = vrot.slane %v3999_v33, %v4174_v61  ;;  %v2688_v26 = vrot.slane %v4003_v36, %v4174_v61 }
 0x760   :  { %v2633_v7 = vmul.f32 %v2620_v39, %v2610_v31  ;;  %v2634_v3 = vmul.f32 %v2624_v25, %v2610_v31  ;;  %v2665_v0 = vmul.f32 %v2652_v11, %v3973_v62  ;;  %v2666_v46 = vmul.f32 %v2656_v30, %v3973_v62 }
 0x761   :  { %v3994_v41 = vpop.permute.xlu1 %2674 }
 0x762   :  { %v2637_v37 = vadd.f32 %v2633_v7, %v3955_v22  ;;  %v2638_v31 = vadd.f32 %v2634_v3, %v3955_v22  ;;  %v2697_v62 = vmul.f32 %v2684_v34, %v3994_v41 }
 0x764   :  { %v2669_v13 = vadd.f32 %v2665_v0, %v2637_v37  ;;  %v2670_v51 = vadd.f32 %v2666_v46, %v2638_v31 }
 0x765   :  { %v1791_v5 = vpop.permute.xlu1 %1790 }
 0x766   :  { %v1831_v49 = vmul.f32 %v1824_v38, %v1791_v5  ;;  %v1832_v23 = vmul.f32 %v1828_v50, %v1791_v5  ;;  %v2698_v5 = vmul.f32 %v2688_v26, %v3994_v41 }
 0x768   :  { %v1835_v43 = vadd.f32 %v1831_v49, %v1783_v2  ;;  %v1836_v8 = vadd.f32 %v1832_v23, %v1784_v60  ;;  %v2701_v49 = vadd.f32 %v2697_v62, %v2669_v13  ;;  %v2702_v39 = vadd.f32 %v2698_v5, %v2670_v51 }
 0x76a   :  { %v1843_v32 = vpop.permute.xlu1 %1842 }
 0x76b   :  { %v1883_v24 = vmul.f32 %v1876_v45, %v1843_v32  ;;  %v1884_v18 = vmul.f32 %v1880_v58, %v1843_v32 }
 0x76d   :  { %v1887_v20 = vadd.f32 %v1883_v24, %v1835_v43  ;;  %v1888_v10 = vadd.f32 %v1884_v18, %v1836_v8 }
 0x76f   :  { %v2443_v59 = vpop.permute.xlu1 %2442  ;;  %v2628_v27 = vrot.slane %v1887_v20, %v2977_v12  ;;  %v2632_v53 = vrot.slane %v1888_v10, %v2977_v12  ;;  %v2660_v12 = vrot.slane %v1887_v20, %v2984_v16  ;;  %v2664_v21 = vrot.slane %v1888_v10, %v2984_v16 }
 0x770   :  { %v2692_v35 = vrot.slane %v1887_v20, %v4174_v61  ;;  %v2696_v52 = vrot.slane %v1888_v10, %v4174_v61  ;;  %v2724_v9 = vrot.slane %v1887_v20, %v4175_v56  ;;  %v2728_v22 = vrot.slane %v1888_v10, %v4175_v56 }
 0x771   :  { %v2635_v19 = vmul.f32 %v2628_v27, %v2615_v6  ;;  %v2636_v4 = vmul.f32 %v2632_v53, %v2615_v6  ;;  %v2433_v16 = vmul.f32 %v3953_v14, %v3867_v48  ;;  %v2720_v48 = vrot.slane %v4003_v36, %v4175_v56 }
 0x772   :  { %v2699_v63 = vmul.f32 %v2692_v35, %v2679_v28  ;;  %v2700_v1 = vmul.f32 %v2696_v52, %v2679_v28  ;;  %v2731_v14 = vmul.f32 %v2724_v9, %v2711_v40  ;;  %v2732_v23 = vmul.f32 %v2728_v22, %v2711_v40 }
 0x773   :  { %v2639_v38 = vadd.f32 %v2635_v19, %v3961_v47  ;;  %v2640_v50 = vadd.f32 %v2636_v4, %v3961_v47  ;;  %v2716_v47 = vrot.slane %v3999_v33, %v4175_v56  ;;  %v2445_v2 = vmul.f32 %v2443_v59, %v3876_v44 }
 0x774   :  { %v2647_v15 = vpop.permute.xlu1 %2646  ;;  %v2440_v41 = vadd.f32 %v2439_v17, %v2433_v16 }
 0x775   :  { %v2667_v55 = vmul.f32 %v2660_v12, %v2647_v15  ;;  %v2668_v42 = vmul.f32 %v2664_v21, %v2647_v15 }
 0x776   :  { %v2446_v6 = vadd.f32 %v2445_v2, %v2440_v41 }
 0x777   :  { %v2671_v54 = vadd.f32 %v2667_v55, %v2639_v38  ;;  %v2672_v57 = vadd.f32 %v2668_v42, %v2640_v50 }
 0x779   :  { %v2703_v45 = vadd.f32 %v2699_v63, %v2671_v54  ;;  %v2704_v61 = vadd.f32 %v2700_v1, %v2672_v57  ;;  %v2707_v58 = vpop.permute.xlu1 %2706 }
 0x77a   :  { %v2729_v60 = vmul.f32 %v2716_v47, %v2707_v58  ;;  %v2730_v25 = vmul.f32 %v2720_v48, %v2707_v58 }
 0x77b   :  { %v2735_v32 = vadd.f32 %v2731_v14, %v2703_v45  ;;  %v2736_v43 = vadd.f32 %v2732_v23, %v2704_v61 }
 0x77c   :  { %v2733_v8 = vadd.f32 %v2729_v60, %v2701_v49  ;;  %v2734_v24 = vadd.f32 %v2730_v25, %v2702_v39 }
 0x77d   :  { %v2742_v18 = vcombine.low %v2735_v32, %v2736_v43  ;;  %v2449_v33 = vpop.permute.xlu1 %2448 }
 0x77e   :  { %v2741_v7 = vcombine.low %v2733_v8, %v2734_v24  ;;  %v2451_v56 = vmul.f32 %v2449_v33, %v3884_v29 }
 0x77f   :  { %2746 = vst [vmem:[%s4066_s11 + $0x8] sm:$0xff] %v2742_v18 }
 0x780   :  { %2745 = vst [vmem:[%s4066_s11] sm:$0xff] %v2741_v7  ;;  %v2452_v44 = vadd.f32 %v2451_v56, %v2446_v6 }
 0x782   :  { %2786 = vst.msk [vmem:[%s4064_s9 + $0x2] sm:$0x3] %vm1519_vm6, %v2452_v44 }
 0x783   :  { %2887 = dma.done.wait [#allocation3], 32  }
 0x784   :  { %2888 = vsyncadd [#allocation3], 4294967264 }
 0x785   :  { %2772 = vsyncpa [#allocation3], 1 }

</bundles_post_ra>
